<compile_context>
chip_gen: v7x
topology: tpu7x:2x2x1
jax: 0.10.0
libtpu: 0.0.40
codegen_flags: <defaults>
</compile_context>

<pallas_src>
import math

import jax
import jax.numpy as jnp
from jax.experimental import pallas as pl
from jax.experimental.pallas import tpu as pltpu

# ---------------- config (small synthetic bert2bert) ----------------
B = 2              # batch
S_ENC = 8          # encoder sequence length
S_DEC = 8          # decoder sequence length (== labels.shape[-1])
HIDDEN = 32        # hidden size
N_HEADS = 4
HEAD_DIM = HIDDEN // N_HEADS
FFN = 64           # intermediate size
VOCAB = 64
MAX_POS = 16
TYPE_VOCAB = 2
N_LAYERS = 1       # encoder layers == decoder layers == 1 (synthetic)
PAD_ID = 0
DEC_START_ID = 2   # decoder_start_token_id (synthetic; bert2bert uses [CLS])
NEG_INF = -1e9
LN_EPS = 1e-12
IGNORE_INDEX = -100


def vmem():
    return pl.BlockSpec(memory_space=pltpu.MemorySpace.VMEM)


# ---------------- in-kernel helpers (traced inside Pallas kernel bodies) ----------------
def _gelu(y):
    # TODO(synk): HF BERT "gelu" is erf-based; tanh approximation used (native EUP tanh).
    c = math.sqrt(2.0 / math.pi)
    return 0.5 * y * (1.0 + jnp.tanh(c * (y + 0.044715 * y * y * y)))


def _layernorm(x, g, b):
    mean = jnp.mean(x, axis=-1, keepdims=True)
    var = jnp.mean((x - mean) ** 2, axis=-1, keepdims=True)
    return (x - mean) * jax.lax.rsqrt(var + LN_EPS) * g + b


def _mha_heads(q, k, v, mask_add):
    # q: (Sq, H), k/v: (Sk, H), mask_add: (Sq, Sk) additive.
    # Per-head attention with softmax denominator via approx reciprocal (EUP slot);
    # heads concatenated back to (Sq, H) -- everything stays in vregs.
    scale = 1.0 / math.sqrt(HEAD_DIM)
    ctx = []
    for h in range(N_HEADS):
        lo, hi = h * HEAD_DIM, (h + 1) * HEAD_DIM
        s = jax.lax.dot_general(
            q[:, lo:hi], k[:, lo:hi], (((1,), (1,)), ((), ())),
            preferred_element_type=jnp.float32) * scale
        s = s + mask_add
        s = s - jnp.max(s, axis=-1, keepdims=True)
        p = jnp.exp(s)
        p = p * pl.reciprocal(jnp.sum(p, axis=-1, keepdims=True), approx=True)
        ctx.append(jnp.dot(p, v[:, lo:hi], preferred_element_type=jnp.float32))
    return jnp.concatenate(ctx, axis=-1)


# ---------------- Pallas kernels ----------------
def _ln_kernel(x_ref, g_ref, b_ref, o_ref):
    o_ref[...] = _layernorm(x_ref[...], g_ref[...], b_ref[...])


def _self_attn_block_kernel(x_ref, m_ref, wqkv_ref, bqkv_ref, wo_ref, bo_ref,
                            g_ref, b_ref, o_ref):
    # x: (S, H), m: (S, S) additive, wqkv: (H, 3H).  Fully fused attention block.
    x = x_ref[...]
    qkv = jnp.dot(x, wqkv_ref[...], preferred_element_type=jnp.float32) + bqkv_ref[...]
    q = qkv[:, :HIDDEN]
    k = qkv[:, HIDDEN:2 * HIDDEN]
    v = qkv[:, 2 * HIDDEN:]
    ctx = _mha_heads(q, k, v, m_ref[...])
    out = jnp.dot(ctx, wo_ref[...], preferred_element_type=jnp.float32) + bo_ref[...] + x
    o_ref[...] = _layernorm(out, g_ref[...], b_ref[...])


def _cross_attn_block_kernel(xq_ref, xkv_ref, m_ref, wq_ref, bq_ref, wkv_ref, bkv_ref,
                             wo_ref, bo_ref, g_ref, b_ref, o_ref):
    # xq: (Sd, H) decoder states, xkv: (Se, H) encoder states, m: (Sd, Se) additive.
    xq = xq_ref[...]
    xkv = xkv_ref[...]
    q = jnp.dot(xq, wq_ref[...], preferred_element_type=jnp.float32) + bq_ref[...]
    kv = jnp.dot(xkv, wkv_ref[...], preferred_element_type=jnp.float32) + bkv_ref[...]
    k = kv[:, :HIDDEN]
    v = kv[:, HIDDEN:]
    ctx = _mha_heads(q, k, v, m_ref[...])
    out = jnp.dot(ctx, wo_ref[...], preferred_element_type=jnp.float32) + bo_ref[...] + xq
    o_ref[...] = _layernorm(out, g_ref[...], b_ref[...])


def _ffn_block_kernel(x_ref, wi_ref, bi_ref, wo_ref, bo_ref, g_ref, b_ref, o_ref):
    # fused: matmul + bias + GELU + matmul + bias + residual + layernorm
    x = x_ref[...]
    h = _gelu(jnp.dot(x, wi_ref[...], preferred_element_type=jnp.float32) + bi_ref[...])
    y = jnp.dot(h, wo_ref[...], preferred_element_type=jnp.float32) + bo_ref[...] + x
    o_ref[...] = _layernorm(y, g_ref[...], b_ref[...])


def _lm_head_kernel(x_ref, tw_ref, tb_ref, g_ref, b_ref, wt_ref, bias_ref, o_ref):
    # BERT LM prediction head: transform dense + GELU + LN, then tied vocab projection.
    t = _gelu(jnp.dot(x_ref[...], tw_ref[...], preferred_element_type=jnp.float32)
              + tb_ref[...])
    t = _layernorm(t, g_ref[...], b_ref[...])
    o_ref[...] = (jnp.dot(t, wt_ref[...], preferred_element_type=jnp.float32)
                  + bias_ref[...])


def _xent_kernel(logits_ref, labels_ref, o_ref):
    # logits: (N, V), labels: (N, 1) int32 -> o: (1, 1) mean NLL over non-ignored tokens.
    x = logits_ref[...]
    labels = labels_ref[...]
    m = jnp.max(x, axis=-1, keepdims=True)
    lse = jnp.log(jnp.sum(jnp.exp(x - m), axis=-1, keepdims=True)) + m
    col = jax.lax.broadcasted_iota(jnp.int32, x.shape, 1)
    picked = jnp.sum(jnp.where(col == labels, x, 0.0), axis=-1, keepdims=True)
    nll = lse - picked                                    # (N, 1)
    valid = (labels != IGNORE_INDEX).astype(jnp.float32)  # ignore_index=-100 handling
    tot = jnp.sum(nll * valid, axis=0, keepdims=True)
    cnt = jnp.maximum(jnp.sum(valid, axis=0, keepdims=True), 1.0)
    o_ref[...] = tot / cnt


# ---------------- kernel wrappers ----------------
def _w_spec(arr):
    return pl.BlockSpec(arr.shape, lambda b: (0, 0))


def pallas_layernorm(x, g, b):
    lead = x.shape[:-1]
    H = x.shape[-1]
    M = int(math.prod(lead))
    out = pl.pallas_call(
        _ln_kernel,
        out_shape=jax.ShapeDtypeStruct((M, H), jnp.float32),
        in_specs=[vmem(), vmem(), vmem()],
        out_specs=vmem(),
    )(x.reshape(M, H), g, b)
    return out.reshape(lead + (H,))


def self_attn_block(x, mask_add, p):
    # x: (B, S, H), mask_add: (B, S, S) additive (NOT broadcast over heads)
    Bsz, S, H = x.shape
    act = pl.BlockSpec((None, S, H), lambda b: (b, 0, 0))
    msk = pl.BlockSpec((None, S, mask_add.shape[-1]), lambda b: (b, 0, 0))
    return pl.pallas_call(
        _self_attn_block_kernel,
        out_shape=jax.ShapeDtypeStruct((Bsz, S, H), jnp.float32),
        grid=(Bsz,),
        in_specs=[act, msk, _w_spec(p["wqkv"]), _w_spec(p["bqkv"]),
                  _w_spec(p["wo"]), _w_spec(p["bo"]),
                  _w_spec(p["ln_g"]), _w_spec(p["ln_b"])],
        out_specs=act,
        compiler_params=pltpu.CompilerParams(dimension_semantics=("parallel",)),
    )(x, mask_add, p["wqkv"], p["bqkv"], p["wo"], p["bo"], p["ln_g"], p["ln_b"])


def cross_attn_block(xq, xkv, mask_add, p):
    # xq: (B, Sd, H) decoder states, xkv: (B, Se, H) encoder states, mask: (B, Sd, Se)
    Bsz, Sd, H = xq.shape
    Se = xkv.shape[1]
    q_spec = pl.BlockSpec((None, Sd, H), lambda b: (b, 0, 0))
    kv_spec = pl.BlockSpec((None, Se, H), lambda b: (b, 0, 0))
    m_spec = pl.BlockSpec((None, Sd, Se), lambda b: (b, 0, 0))
    return pl.pallas_call(
        _cross_attn_block_kernel,
        out_shape=jax.ShapeDtypeStruct((Bsz, Sd, H), jnp.float32),
        grid=(Bsz,),
        in_specs=[q_spec, kv_spec, m_spec,
                  _w_spec(p["wq"]), _w_spec(p["bq"]),
                  _w_spec(p["wkv"]), _w_spec(p["bkv"]),
                  _w_spec(p["wo"]), _w_spec(p["bo"]),
                  _w_spec(p["ln_g"]), _w_spec(p["ln_b"])],
        out_specs=q_spec,
        compiler_params=pltpu.CompilerParams(dimension_semantics=("parallel",)),
    )(xq, xkv, mask_add, p["wq"], p["bq"], p["wkv"], p["bkv"],
      p["wo"], p["bo"], p["ln_g"], p["ln_b"])


def ffn_block(x, p):
    lead = x.shape[:-1]
    M = int(math.prod(lead))
    out = pl.pallas_call(
        _ffn_block_kernel,
        out_shape=jax.ShapeDtypeStruct((M, HIDDEN), jnp.float32),
        in_specs=[vmem()] * 7,
        out_specs=vmem(),
    )(x.reshape(M, HIDDEN), p["wi"], p["bi"], p["wo"], p["bo"], p["ln_g"], p["ln_b"])
    return out.reshape(lead + (HIDDEN,))


def lm_head(x, p):
    lead = x.shape[:-1]
    M = int(math.prod(lead))
    out = pl.pallas_call(
        _lm_head_kernel,
        out_shape=jax.ShapeDtypeStruct((M, VOCAB), jnp.float32),
        in_specs=[vmem()] * 7,
        out_specs=vmem(),
    )(x.reshape(M, HIDDEN), p["tw"], p["tb"], p["ln_g"], p["ln_b"], p["word_t"], p["bias"])
    return out.reshape(lead + (VOCAB,))


def pallas_xent(logits2d, labels1d):
    out = pl.pallas_call(
        _xent_kernel,
        out_shape=jax.ShapeDtypeStruct((1, 1), jnp.float32),
        in_specs=[vmem(), vmem()],
        out_specs=vmem(),
    )(logits2d, labels1d.reshape(-1, 1).astype(jnp.int32))
    return out[0, 0]


# ---------------- parameters (deterministic, synthetic) ----------------
def init_params(key):
    cnt = [0]

    def w(shape, scale=0.02):
        cnt[0] += 1
        return scale * jax.random.normal(jax.random.fold_in(key, cnt[0]), shape, jnp.float32)

    def z(*shape):
        return jnp.zeros(shape, jnp.float32)

    def ones(*shape):
        return jnp.ones(shape, jnp.float32)

    def self_attn_p():
        # QKV fused into a single (H, 3H) matmul (perf review item 1a)
        return dict(wqkv=w((HIDDEN, 3 * HIDDEN)), bqkv=z(1, 3 * HIDDEN),
                    wo=w((HIDDEN, HIDDEN)), bo=z(1, HIDDEN),
                    ln_g=ones(1, HIDDEN), ln_b=z(1, HIDDEN))

    def cross_attn_p():
        # K/V fused into a single (H, 2H) matmul over encoder states
        return dict(wq=w((HIDDEN, HIDDEN)), bq=z(1, HIDDEN),
                    wkv=w((HIDDEN, 2 * HIDDEN)), bkv=z(1, 2 * HIDDEN),
                    wo=w((HIDDEN, HIDDEN)), bo=z(1, HIDDEN),
                    ln_g=ones(1, HIDDEN), ln_b=z(1, HIDDEN))

    def ffn_p():
        return dict(wi=w((HIDDEN, FFN)), bi=z(1, FFN),
                    wo=w((FFN, HIDDEN)), bo=z(1, HIDDEN),
                    ln_g=ones(1, HIDDEN), ln_b=z(1, HIDDEN))

    def emb_p():
        return dict(word=w((VOCAB, HIDDEN)), pos=w((MAX_POS, HIDDEN)),
                    type=w((TYPE_VOCAB, HIDDEN)),
                    ln_g=ones(1, HIDDEN), ln_b=z(1, HIDDEN))

    enc_emb = emb_p()
    enc_layers = [dict(attn=self_attn_p(), ffn=ffn_p()) for _ in range(N_LAYERS)]
    dec_emb = emb_p()
    dec_layers = [dict(self_attn=self_attn_p(), cross=cross_attn_p(), ffn=ffn_p())
                  for _ in range(N_LAYERS)]
    lm = dict(tw=w((HIDDEN, HIDDEN)), tb=z(1, HIDDEN),
              ln_g=ones(1, HIDDEN), ln_b=z(1, HIDDEN),
              bias=z(1, VOCAB),
              # tied output weights: pre-transposed ONCE at init (no per-call .T)
              word_t=dec_emb["word"].T)
    return dict(enc_emb=enc_emb, enc_layers=enc_layers,
                dec_emb=dec_emb, dec_layers=dec_layers, lm=lm)


# ---------------- model forward (mirrors Bert2Bert.forward) ----------------
def embed(ids, token_type_ids, emb):
    S = ids.shape[1]
    word = jnp.take(emb["word"], ids, axis=0)            # gather, not one-hot matmul
    pos = emb["pos"][:S][None, :, :]
    typ = jnp.take(emb["type"], token_type_ids, axis=0)
    return pallas_layernorm(word + pos + typ, emb["ln_g"], emb["ln_b"])


def bert2bert_forward(params, input_ids, attention_mask, token_type_ids, labels, num_tokens):
    Bsz, Se = input_ids.shape
    Sd = labels.shape[-1]

    # ---------- encoder ----------
    key_mask_add = (1.0 - attention_mask.astype(jnp.float32)) * NEG_INF      # (B, Se)
    enc_mask_add = jnp.broadcast_to(key_mask_add[:, None, :], (Bsz, Se, Se))  # per-batch only
    h = embed(input_ids, token_type_ids, params["enc_emb"])
    for layer in params["enc_layers"]:
        h = self_attn_block(h, enc_mask_add, layer["attn"])
        h = ffn_block(h, layer["ffn"])
    enc_out = h

    # ---------- decoder inputs: shift_tokens_right(labels, pad, decoder_start) ----------
    dec_in = jnp.concatenate(
        [jnp.full((Bsz, 1), DEC_START_ID, labels.dtype), labels[:, :-1]], axis=1)
    dec_in = jnp.where(dec_in == IGNORE_INDEX, PAD_ID, dec_in)

    # ---------- decoder_attention_mask exactly as in Bert2Bert.forward ----------
    idx = jnp.arange(Sd)
    index_matrix = idx.reshape(1, 1, Sd)
    index_matrix_t = idx.reshape(1, Sd, 1)
    tril = index_matrix <= index_matrix_t
    nt = num_tokens.reshape(-1, 1, 1)
    dec_mask = (index_matrix < nt) & (index_matrix_t < nt) & tril             # (B, Sd, Sd)
    dec_mask_add = (1.0 - dec_mask.astype(jnp.float32)) * NEG_INF

    cross_mask_add = jnp.broadcast_to(key_mask_add[:, None, :], (Bsz, Sd, Se))

    # ---------- decoder ----------
    d = embed(dec_in, jnp.zeros_like(dec_in), params["dec_emb"])
    for layer in params["dec_layers"]:
        d = self_attn_block(d, dec_mask_add, layer["self_attn"])
        d = cross_attn_block(d, enc_out, cross_mask_add, layer["cross"])
        d = ffn_block(d, layer["ffn"])

    # ---------- LM head (transform + LN + tied vocab projection), one fused kernel ----------
    logits = lm_head(d, params["lm"])                                         # (B, Sd, V)

    # ---------- loss: CrossEntropyLoss(logits.view(-1, V), labels.view(-1)), ignore_index=-100
    loss = pallas_xent(logits.reshape(-1, VOCAB), labels.reshape(-1))
    return loss, logits


# ---------------- main ----------------
if __name__ == "__main__":
    key = jax.random.PRNGKey(0)
    pkey, k1, k2 = jax.random.split(key, 3)
    params = init_params(pkey)

    input_ids = jax.random.randint(k1, (B, S_ENC), 3, VOCAB, dtype=jnp.int32)
    attention_mask = jnp.array([[1, 1, 1, 1, 1, 1, 1, 1],
                                [1, 1, 1, 1, 1, 1, 0, 0]], dtype=jnp.int32)
    token_type_ids = jnp.zeros((B, S_ENC), dtype=jnp.int32)
    labels = jax.random.randint(k2, (B, S_DEC), 3, VOCAB, dtype=jnp.int32)
    num_tokens = jnp.array([8, 5], dtype=jnp.int32)

    fwd = jax.jit(bert2bert_forward)
    loss, logits = fwd(params, input_ids, attention_mask, token_type_ids, labels, num_tokens)
    jax.block_until_ready((loss, logits))
    assert logits.shape == (B, S_DEC, VOCAB)
    assert loss.shape == ()
    print("KERNEL_OK")
</pallas_src>

<mosaic_0001>
module attributes {stable_mosaic.version = 11 : i64} {
  func.func @_ln_kernel(%arg0: memref<16x32xf32, #tpu.memory_space<vmem>>, %arg1: memref<1x32xf32, #tpu.memory_space<vmem>>, %arg2: memref<1x32xf32, #tpu.memory_space<vmem>>, %arg3: memref<16x32xf32, #tpu.memory_space<vmem>>) attributes {dimension_semantics = [], scalar_prefetch = 0 : i64, scratch_operands = 0 : i64, tpu.core_type = #tpu.core_type<tc>} {
    %c0 = arith.constant 0 : index
    %c0_0 = arith.constant 0 : index
    %0 = vector.load %arg0[%c0, %c0_0] : memref<16x32xf32, #tpu.memory_space<vmem>>, vector<16x32xf32>
    %c0_1 = arith.constant 0 : index
    %c0_2 = arith.constant 0 : index
    %1 = vector.load %arg1[%c0_1, %c0_2] : memref<1x32xf32, #tpu.memory_space<vmem>>, vector<1x32xf32>
    %c0_3 = arith.constant 0 : index
    %c0_4 = arith.constant 0 : index
    %2 = vector.load %arg2[%c0_3, %c0_4] : memref<1x32xf32, #tpu.memory_space<vmem>>, vector<1x32xf32>
    %cst = arith.constant dense<0.000000e+00> : vector<16xf32>
    %3 = vector.multi_reduction <add>, %0, %cst [1] : vector<16x32xf32> to vector<16xf32>
    %4 = vector.shape_cast %3 : vector<16xf32> to vector<16x1xf32>
    %cst_5 = arith.constant 3.200000e+01 : f32
    %5 = vector.broadcast %cst_5 : f32 to vector<16x1xf32>
    %6 = arith.divf %4, %5 : vector<16x1xf32>
    %7 = vector.broadcast %6 : vector<16x1xf32> to vector<16x32xf32>
    %8 = arith.subf %0, %7 : vector<16x32xf32>
    %9 = arith.mulf %8, %8 : vector<16x32xf32>
    %cst_6 = arith.constant dense<0.000000e+00> : vector<16xf32>
    %10 = vector.multi_reduction <add>, %9, %cst_6 [1] : vector<16x32xf32> to vector<16xf32>
    %11 = vector.shape_cast %10 : vector<16xf32> to vector<16x1xf32>
    %cst_7 = arith.constant 3.200000e+01 : f32
    %12 = vector.broadcast %cst_7 : f32 to vector<16x1xf32>
    %13 = arith.divf %11, %12 : vector<16x1xf32>
    %14 = vector.broadcast %6 : vector<16x1xf32> to vector<16x32xf32>
    %15 = arith.subf %0, %14 : vector<16x32xf32>
    %cst_8 = arith.constant 9.99999996E-13 : f32
    %16 = vector.broadcast %cst_8 : f32 to vector<16x1xf32>
    %17 = arith.addf %13, %16 : vector<16x1xf32>
    %18 = math.rsqrt %17 : vector<16x1xf32>
    %19 = vector.broadcast %18 : vector<16x1xf32> to vector<16x32xf32>
    %20 = arith.mulf %15, %19 : vector<16x32xf32>
    %21 = vector.broadcast %1 : vector<1x32xf32> to vector<16x32xf32>
    %22 = arith.mulf %20, %21 : vector<16x32xf32>
    %23 = vector.broadcast %2 : vector<1x32xf32> to vector<16x32xf32>
    %24 = arith.addf %22, %23 : vector<16x32xf32>
    %c0_9 = arith.constant 0 : index
    %c0_10 = arith.constant 0 : index
    %25 = vector.load %arg3[%c0_9, %c0_10] : memref<16x32xf32, #tpu.memory_space<vmem>>, vector<16x32xf32>
    tpu.vector_store %arg3[%c0_9, %c0_10], %24 {strides = array<i32>} : memref<16x32xf32, #tpu.memory_space<vmem>>, vector<16x32xf32>,
    return
  }
}

module attributes {stable_mosaic.version = 11 : i64} {
  func.func @_self_attn_block_kernel(%arg0: i32, %arg1: memref<1x8x32xf32, #tpu.memory_space<vmem>>, %arg2: memref<1x8x8xf32, #tpu.memory_space<vmem>>, %arg3: memref<32x96xf32, #tpu.memory_space<vmem>>, %arg4: memref<1x96xf32, #tpu.memory_space<vmem>>, %arg5: memref<32x32xf32, #tpu.memory_space<vmem>>, %arg6: memref<1x32xf32, #tpu.memory_space<vmem>>, %arg7: memref<1x32xf32, #tpu.memory_space<vmem>>, %arg8: memref<1x32xf32, #tpu.memory_space<vmem>>, %arg9: memref<1x8x32xf32, #tpu.memory_space<vmem>>) attributes {dimension_semantics = [#tpu.dimension_semantics<parallel>], iteration_bounds = array<i64: 2>, scalar_prefetch = 0 : i64, scratch_operands = 0 : i64, tpu.core_type = #tpu.core_type<tc>, window_params = [{transform_indices = @transform_0, window_bounds = array<i64: 1, 8, 32>}, {transform_indices = @transform_1, window_bounds = array<i64: 1, 8, 8>}, {pipeline_mode = #tpu.pipeline_mode<synchronous>, transform_indices = @transform_2, window_bounds = array<i64: 32, 96>}, {pipeline_mode = #tpu.pipeline_mode<synchronous>, transform_indices = @transform_3, window_bounds = array<i64: 1, 96>}, {pipeline_mode = #tpu.pipeline_mode<synchronous>, transform_indices = @transform_4, window_bounds = array<i64: 32, 32>}, {pipeline_mode = #tpu.pipeline_mode<synchronous>, transform_indices = @transform_5, window_bounds = array<i64: 1, 32>}, {pipeline_mode = #tpu.pipeline_mode<synchronous>, transform_indices = @transform_6, window_bounds = array<i64: 1, 32>}, {pipeline_mode = #tpu.pipeline_mode<synchronous>, transform_indices = @transform_7, window_bounds = array<i64: 1, 32>}, {transform_indices = @transform_8, window_bounds = array<i64: 1, 8, 32>}]} {
    %c0 = arith.constant 0 : index
    %c0_0 = arith.constant 0 : index
    %c0_1 = arith.constant 0 : index
    %0 = vector.load %arg1[%c0, %c0_0, %c0_1] : memref<1x8x32xf32, #tpu.memory_space<vmem>>, vector<1x8x32xf32>
    %1 = vector.shape_cast %0 : vector<1x8x32xf32> to vector<8x32xf32>
    %c0_2 = arith.constant 0 : index
    %c0_3 = arith.constant 0 : index
    %2 = vector.load %arg3[%c0_2, %c0_3] : memref<32x96xf32, #tpu.memory_space<vmem>>, vector<32x96xf32>
    %cst = arith.constant dense<0.000000e+00> : vector<8x96xf32>
    %3 = tpu.matmul %1, %2, %cst {dimension_numbers = #tpu.dot_dimension_numbers<[1], [0], [0], [1], [0, 0, 1, 1], [], []>} : vector<8x32xf32>, vector<32x96xf32>, vector<8x96xf32> -> vector<8x96xf32>
    %c0_4 = arith.constant 0 : index
    %c0_5 = arith.constant 0 : index
    %4 = vector.load %arg4[%c0_4, %c0_5] : memref<1x96xf32, #tpu.memory_space<vmem>>, vector<1x96xf32>
    %5 = vector.broadcast %4 : vector<1x96xf32> to vector<8x96xf32>
    %6 = arith.addf %3, %5 : vector<8x96xf32>
    %7 = vector.extract_strided_slice %6 {offsets = [0, 0], sizes = [8, 32], strides = [1, 1]} : vector<8x96xf32> to vector<8x32xf32>
    %8 = vector.extract_strided_slice %6 {offsets = [0, 32], sizes = [8, 32], strides = [1, 1]} : vector<8x96xf32> to vector<8x32xf32>
    %9 = vector.extract_strided_slice %6 {offsets = [0, 64], sizes = [8, 32], strides = [1, 1]} : vector<8x96xf32> to vector<8x32xf32>
    %c0_6 = arith.constant 0 : index
    %c0_7 = arith.constant 0 : index
    %c0_8 = arith.constant 0 : index
    %10 = vector.load %arg2[%c0_6, %c0_7, %c0_8] : memref<1x8x8xf32, #tpu.memory_space<vmem>>, vector<1x8x8xf32>
    %11 = vector.shape_cast %10 : vector<1x8x8xf32> to vector<8x8xf32>
    %12 = vector.extract_strided_slice %7 {offsets = [0, 0], sizes = [8, 8], strides = [1, 1]} : vector<8x32xf32> to vector<8x8xf32>
    %13 = vector.extract_strided_slice %8 {offsets = [0, 0], sizes = [8, 8], strides = [1, 1]} : vector<8x32xf32> to vector<8x8xf32>
    %cst_9 = arith.constant dense<0.000000e+00> : vector<8x8xf32>
    %14 = tpu.matmul %12, %13, %cst_9 {dimension_numbers = #tpu.dot_dimension_numbers<[1], [1], [0], [0], [0, 0, 1, 0], [], []>} : vector<8x8xf32>, vector<8x8xf32>, vector<8x8xf32> -> vector<8x8xf32>
    %cst_10 = arith.constant 0.353553385 : f32
    %15 = vector.broadcast %cst_10 : f32 to vector<8x8xf32>
    %16 = arith.mulf %14, %15 : vector<8x8xf32>
    %17 = arith.addf %16, %11 : vector<8x8xf32>
    %cst_11 = arith.constant dense<0xFF800000> : vector<8xf32>
    %18 = vector.multi_reduction <maximumf>, %17, %cst_11 [1] : vector<8x8xf32> to vector<8xf32>
    %19 = vector.shape_cast %18 : vector<8xf32> to vector<8x1xf32>
    %20 = vector.broadcast %19 : vector<8x1xf32> to vector<8x8xf32>
    %21 = arith.subf %17, %20 : vector<8x8xf32>
    %22 = math.exp %21 : vector<8x8xf32>
    %cst_12 = arith.constant dense<0.000000e+00> : vector<8xf32>
    %23 = vector.multi_reduction <add>, %22, %cst_12 [1] : vector<8x8xf32> to vector<8xf32>
    %24 = vector.shape_cast %23 : vector<8xf32> to vector<8x1xf32>
    %25 = tpu.reciprocal %24 {approx = true} : vector<8x1xf32> -> vector<8x1xf32>
    %26 = vector.broadcast %25 : vector<8x1xf32> to vector<8x8xf32>
    %27 = arith.mulf %22, %26 : vector<8x8xf32>
    %28 = vector.extract_strided_slice %9 {offsets = [0, 0], sizes = [8, 8], strides = [1, 1]} : vector<8x32xf32> to vector<8x8xf32>
    %cst_13 = arith.constant dense<0.000000e+00> : vector<8x8xf32>
    %29 = tpu.matmul %27, %28, %cst_13 {dimension_numbers = #tpu.dot_dimension_numbers<[1], [0], [0], [1], [0, 0, 1, 1], [], []>} : vector<8x8xf32>, vector<8x8xf32>, vector<8x8xf32> -> vector<8x8xf32>
    %30 = vector.extract_strided_slice %7 {offsets = [0, 8], sizes = [8, 8], strides = [1, 1]} : vector<8x32xf32> to vector<8x8xf32>
    %31 = vector.extract_strided_slice %8 {offsets = [0, 8], sizes = [8, 8], strides = [1, 1]} : vector<8x32xf32> to vector<8x8xf32>
    %cst_14 = arith.constant dense<0.000000e+00> : vector<8x8xf32>
    %32 = tpu.matmul %30, %31, %cst_14 {dimension_numbers = #tpu.dot_dimension_numbers<[1], [1], [0], [0], [0, 0, 1, 0], [], []>} : vector<8x8xf32>, vector<8x8xf32>, vector<8x8xf32> -> vector<8x8xf32>
    %cst_15 = arith.constant 0.353553385 : f32
    %33 = vector.broadcast %cst_15 : f32 to vector<8x8xf32>
    %34 = arith.mulf %32, %33 : vector<8x8xf32>
    %35 = arith.addf %34, %11 : vector<8x8xf32>
    %cst_16 = arith.constant dense<0xFF800000> : vector<8xf32>
    %36 = vector.multi_reduction <maximumf>, %35, %cst_16 [1] : vector<8x8xf32> to vector<8xf32>
    %37 = vector.shape_cast %36 : vector<8xf32> to vector<8x1xf32>
    %38 = vector.broadcast %37 : vector<8x1xf32> to vector<8x8xf32>
    %39 = arith.subf %35, %38 : vector<8x8xf32>
    %40 = math.exp %39 : vector<8x8xf32>
    %cst_17 = arith.constant dense<0.000000e+00> : vector<8xf32>
    %41 = vector.multi_reduction <add>, %40, %cst_17 [1] : vector<8x8xf32> to vector<8xf32>
    %42 = vector.shape_cast %41 : vector<8xf32> to vector<8x1xf32>
    %43 = tpu.reciprocal %42 {approx = true} : vector<8x1xf32> -> vector<8x1xf32>
    %44 = vector.broadcast %43 : vector<8x1xf32> to vector<8x8xf32>
    %45 = arith.mulf %40, %44 : vector<8x8xf32>
    %46 = vector.extract_strided_slice %9 {offsets = [0, 8], sizes = [8, 8], strides = [1, 1]} : vector<8x32xf32> to vector<8x8xf32>
    %cst_18 = arith.constant dense<0.000000e+00> : vector<8x8xf32>
    %47 = tpu.matmul %45, %46, %cst_18 {dimension_numbers = #tpu.dot_dimension_numbers<[1], [0], [0], [1], [0, 0, 1, 1], [], []>} : vector<8x8xf32>, vector<8x8xf32>, vector<8x8xf32> -> vector<8x8xf32>
    %48 = vector.extract_strided_slice %7 {offsets = [0, 16], sizes = [8, 8], strides = [1, 1]} : vector<8x32xf32> to vector<8x8xf32>
    %49 = vector.extract_strided_slice %8 {offsets = [0, 16], sizes = [8, 8], strides = [1, 1]} : vector<8x32xf32> to vector<8x8xf32>
    %cst_19 = arith.constant dense<0.000000e+00> : vector<8x8xf32>
    %50 = tpu.matmul %48, %49, %cst_19 {dimension_numbers = #tpu.dot_dimension_numbers<[1], [1], [0], [0], [0, 0, 1, 0], [], []>} : vector<8x8xf32>, vector<8x8xf32>, vector<8x8xf32> -> vector<8x8xf32>
    %cst_20 = arith.constant 0.353553385 : f32
    %51 = vector.broadcast %cst_20 : f32 to vector<8x8xf32>
    %52 = arith.mulf %50, %51 : vector<8x8xf32>
    %53 = arith.addf %52, %11 : vector<8x8xf32>
    %cst_21 = arith.constant dense<0xFF800000> : vector<8xf32>
    %54 = vector.multi_reduction <maximumf>, %53, %cst_21 [1] : vector<8x8xf32> to vector<8xf32>
    %55 = vector.shape_cast %54 : vector<8xf32> to vector<8x1xf32>
    %56 = vector.broadcast %55 : vector<8x1xf32> to vector<8x8xf32>
    %57 = arith.subf %53, %56 : vector<8x8xf32>
    %58 = math.exp %57 : vector<8x8xf32>
    %cst_22 = arith.constant dense<0.000000e+00> : vector<8xf32>
    %59 = vector.multi_reduction <add>, %58, %cst_22 [1] : vector<8x8xf32> to vector<8xf32>
    %60 = vector.shape_cast %59 : vector<8xf32> to vector<8x1xf32>
    %61 = tpu.reciprocal %60 {approx = true} : vector<8x1xf32> -> vector<8x1xf32>
    %62 = vector.broadcast %61 : vector<8x1xf32> to vector<8x8xf32>
    %63 = arith.mulf %58, %62 : vector<8x8xf32>
    %64 = vector.extract_strided_slice %9 {offsets = [0, 16], sizes = [8, 8], strides = [1, 1]} : vector<8x32xf32> to vector<8x8xf32>
    %cst_23 = arith.constant dense<0.000000e+00> : vector<8x8xf32>
    %65 = tpu.matmul %63, %64, %cst_23 {dimension_numbers = #tpu.dot_dimension_numbers<[1], [0], [0], [1], [0, 0, 1, 1], [], []>} : vector<8x8xf32>, vector<8x8xf32>, vector<8x8xf32> -> vector<8x8xf32>
    %66 = vector.extract_strided_slice %7 {offsets = [0, 24], sizes = [8, 8], strides = [1, 1]} : vector<8x32xf32> to vector<8x8xf32>
    %67 = vector.extract_strided_slice %8 {offsets = [0, 24], sizes = [8, 8], strides = [1, 1]} : vector<8x32xf32> to vector<8x8xf32>
    %cst_24 = arith.constant dense<0.000000e+00> : vector<8x8xf32>
    %68 = tpu.matmul %66, %67, %cst_24 {dimension_numbers = #tpu.dot_dimension_numbers<[1], [1], [0], [0], [0, 0, 1, 0], [], []>} : vector<8x8xf32>, vector<8x8xf32>, vector<8x8xf32> -> vector<8x8xf32>
    %cst_25 = arith.constant 0.353553385 : f32
    %69 = vector.broadcast %cst_25 : f32 to vector<8x8xf32>
    %70 = arith.mulf %68, %69 : vector<8x8xf32>
    %71 = arith.addf %70, %11 : vector<8x8xf32>
    %cst_26 = arith.constant dense<0xFF800000> : vector<8xf32>
    %72 = vector.multi_reduction <maximumf>, %71, %cst_26 [1] : vector<8x8xf32> to vector<8xf32>
    %73 = vector.shape_cast %72 : vector<8xf32> to vector<8x1xf32>
    %74 = vector.broadcast %73 : vector<8x1xf32> to vector<8x8xf32>
    %75 = arith.subf %71, %74 : vector<8x8xf32>
    %76 = math.exp %75 : vector<8x8xf32>
    %cst_27 = arith.constant dense<0.000000e+00> : vector<8xf32>
    %77 = vector.multi_reduction <add>, %76, %cst_27 [1] : vector<8x8xf32> to vector<8xf32>
    %78 = vector.shape_cast %77 : vector<8xf32> to vector<8x1xf32>
    %79 = tpu.reciprocal %78 {approx = true} : vector<8x1xf32> -> vector<8x1xf32>
    %80 = vector.broadcast %79 : vector<8x1xf32> to vector<8x8xf32>
    %81 = arith.mulf %76, %80 : vector<8x8xf32>
    %82 = vector.extract_strided_slice %9 {offsets = [0, 24], sizes = [8, 8], strides = [1, 1]} : vector<8x32xf32> to vector<8x8xf32>
    %cst_28 = arith.constant dense<0.000000e+00> : vector<8x8xf32>
    %83 = tpu.matmul %81, %82, %cst_28 {dimension_numbers = #tpu.dot_dimension_numbers<[1], [0], [0], [1], [0, 0, 1, 1], [], []>} : vector<8x8xf32>, vector<8x8xf32>, vector<8x8xf32> -> vector<8x8xf32>
    %84 = tpu.concatenate %29, %47, %65, %83 in 1 : vector<8x8xf32>, vector<8x8xf32>, vector<8x8xf32>, vector<8x8xf32> -> vector<8x32xf32>
    %c0_29 = arith.constant 0 : index
    %c0_30 = arith.constant 0 : index
    %85 = vector.load %arg5[%c0_29, %c0_30] : memref<32x32xf32, #tpu.memory_space<vmem>>, vector<32x32xf32>
    %cst_31 = arith.constant dense<0.000000e+00> : vector<8x32xf32>
    %86 = tpu.matmul %84, %85, %cst_31 {dimension_numbers = #tpu.dot_dimension_numbers<[1], [0], [0], [1], [0, 0, 1, 1], [], []>} : vector<8x32xf32>, vector<32x32xf32>, vector<8x32xf32> -> vector<8x32xf32>
    %c0_32 = arith.constant 0 : index
    %c0_33 = arith.constant 0 : index
    %87 = vector.load %arg6[%c0_32, %c0_33] : memref<1x32xf32, #tpu.memory_space<vmem>>, vector<1x32xf32>
    %88 = vector.broadcast %87 : vector<1x32xf32> to vector<8x32xf32>
    %89 = arith.addf %86, %88 : vector<8x32xf32>
    %90 = arith.addf %89, %1 : vector<8x32xf32>
    %c0_34 = arith.constant 0 : index
    %c0_35 = arith.constant 0 : index
    %91 = vector.load %arg7[%c0_34, %c0_35] : memref<1x32xf32, #tpu.memory_space<vmem>>, vector<1x32xf32>
    %c0_36 = arith.constant 0 : index
    %c0_37 = arith.constant 0 : index
    %92 = vector.load %arg8[%c0_36, %c0_37] : memref<1x32xf32, #tpu.memory_space<vmem>>, vector<1x32xf32>
    %cst_38 = arith.constant dense<0.000000e+00> : vector<8xf32>
    %93 = vector.multi_reduction <add>, %90, %cst_38 [1] : vector<8x32xf32> to vector<8xf32>
    %94 = vector.shape_cast %93 : vector<8xf32> to vector<8x1xf32>
    %cst_39 = arith.constant 3.200000e+01 : f32
    %95 = vector.broadcast %cst_39 : f32 to vector<8x1xf32>
    %96 = arith.divf %94, %95 : vector<8x1xf32>
    %97 = vector.broadcast %96 : vector<8x1xf32> to vector<8x32xf32>
    %98 = arith.subf %90, %97 : vector<8x32xf32>
    %99 = arith.mulf %98, %98 : vector<8x32xf32>
    %cst_40 = arith.constant dense<0.000000e+00> : vector<8xf32>
    %100 = vector.multi_reduction <add>, %99, %cst_40 [1] : vector<8x32xf32> to vector<8xf32>
    %101 = vector.shape_cast %100 : vector<8xf32> to vector<8x1xf32>
    %cst_41 = arith.constant 3.200000e+01 : f32
    %102 = vector.broadcast %cst_41 : f32 to vector<8x1xf32>
    %103 = arith.divf %101, %102 : vector<8x1xf32>
    %104 = vector.broadcast %96 : vector<8x1xf32> to vector<8x32xf32>
    %105 = arith.subf %90, %104 : vector<8x32xf32>
    %cst_42 = arith.constant 9.99999996E-13 : f32
    %106 = vector.broadcast %cst_42 : f32 to vector<8x1xf32>
    %107 = arith.addf %103, %106 : vector<8x1xf32>
    %108 = math.rsqrt %107 : vector<8x1xf32>
    %109 = vector.broadcast %108 : vector<8x1xf32> to vector<8x32xf32>
    %110 = arith.mulf %105, %109 : vector<8x32xf32>
    %111 = vector.broadcast %91 : vector<1x32xf32> to vector<8x32xf32>
    %112 = arith.mulf %110, %111 : vector<8x32xf32>
    %113 = vector.broadcast %92 : vector<1x32xf32> to vector<8x32xf32>
    %114 = arith.addf %112, %113 : vector<8x32xf32>
    %c0_43 = arith.constant 0 : index
    %c0_44 = arith.constant 0 : index
    %c0_45 = arith.constant 0 : index
    %115 = vector.load %arg9[%c0_43, %c0_44, %c0_45] : memref<1x8x32xf32, #tpu.memory_space<vmem>>, vector<1x8x32xf32>
    %116 = vector.shape_cast %115 : vector<1x8x32xf32> to vector<8x32xf32>
    %117 = vector.shape_cast %114 : vector<8x32xf32> to vector<1x8x32xf32>
    tpu.vector_store %arg9[%c0_43, %c0_44, %c0_45], %117 {strides = array<i32>} : memref<1x8x32xf32, #tpu.memory_space<vmem>>, vector<1x8x32xf32>,
    return
  }
  func.func @transform_0(%arg0: i32) -> (i32, i32, i32) {
    %c0_i32 = arith.constant 0 : i32
    %c0_i32_0 = arith.constant 0 : i32
    %c0_i32_1 = arith.constant 0 : i32
    return %arg0, %c0_i32, %c0_i32_0 : i32, i32, i32
  }
  func.func @transform_1(%arg0: i32) -> (i32, i32, i32) {
    %c0_i32 = arith.constant 0 : i32
    %c0_i32_0 = arith.constant 0 : i32
    %c0_i32_1 = arith.constant 0 : i32
    return %arg0, %c0_i32, %c0_i32_0 : i32, i32, i32
  }
  func.func @transform_2(%arg0: i32) -> (i32, i32) {
    %c0_i32 = arith.constant 0 : i32
    %c0_i32_0 = arith.constant 0 : i32
    %c0_i32_1 = arith.constant 0 : i32
    return %c0_i32, %c0_i32_0 : i32, i32
  }
  func.func @transform_3(%arg0: i32) -> (i32, i32) {
    %c0_i32 = arith.constant 0 : i32
    %c0_i32_0 = arith.constant 0 : i32
    %c0_i32_1 = arith.constant 0 : i32
    return %c0_i32, %c0_i32_0 : i32, i32
  }
  func.func @transform_4(%arg0: i32) -> (i32, i32) {
    %c0_i32 = arith.constant 0 : i32
    %c0_i32_0 = arith.constant 0 : i32
    %c0_i32_1 = arith.constant 0 : i32
    return %c0_i32, %c0_i32_0 : i32, i32
  }
  func.func @transform_5(%arg0: i32) -> (i32, i32) {
    %c0_i32 = arith.constant 0 : i32
    %c0_i32_0 = arith.constant 0 : i32
    %c0_i32_1 = arith.constant 0 : i32
    return %c0_i32, %c0_i32_0 : i32, i32
  }
  func.func @transform_6(%arg0: i32) -> (i32, i32) {
    %c0_i32 = arith.constant 0 : i32
    %c0_i32_0 = arith.constant 0 : i32
    %c0_i32_1 = arith.constant 0 : i32
    return %c0_i32, %c0_i32_0 : i32, i32
  }
  func.func @transform_7(%arg0: i32) -> (i32, i32) {
    %c0_i32 = arith.constant 0 : i32
    %c0_i32_0 = arith.constant 0 : i32
    %c0_i32_1 = arith.constant 0 : i32
    return %c0_i32, %c0_i32_0 : i32, i32
  }
  func.func @transform_8(%arg0: i32) -> (i32, i32, i32) {
    %c0_i32 = arith.constant 0 : i32
    %c0_i32_0 = arith.constant 0 : i32
    %c0_i32_1 = arith.constant 0 : i32
    return %arg0, %c0_i32, %c0_i32_0 : i32, i32, i32
  }
}

module attributes {stable_mosaic.version = 11 : i64} {
  func.func @_ffn_block_kernel(%arg0: memref<16x32xf32, #tpu.memory_space<vmem>>, %arg1: memref<32x64xf32, #tpu.memory_space<vmem>>, %arg2: memref<1x64xf32, #tpu.memory_space<vmem>>, %arg3: memref<64x32xf32, #tpu.memory_space<vmem>>, %arg4: memref<1x32xf32, #tpu.memory_space<vmem>>, %arg5: memref<1x32xf32, #tpu.memory_space<vmem>>, %arg6: memref<1x32xf32, #tpu.memory_space<vmem>>, %arg7: memref<16x32xf32, #tpu.memory_space<vmem>>) attributes {dimension_semantics = [], scalar_prefetch = 0 : i64, scratch_operands = 0 : i64, tpu.core_type = #tpu.core_type<tc>} {
    %c0 = arith.constant 0 : index
    %c0_0 = arith.constant 0 : index
    %0 = vector.load %arg0[%c0, %c0_0] : memref<16x32xf32, #tpu.memory_space<vmem>>, vector<16x32xf32>
    %c0_1 = arith.constant 0 : index
    %c0_2 = arith.constant 0 : index
    %1 = vector.load %arg1[%c0_1, %c0_2] : memref<32x64xf32, #tpu.memory_space<vmem>>, vector<32x64xf32>
    %cst = arith.constant dense<0.000000e+00> : vector<16x64xf32>
    %2 = tpu.matmul %0, %1, %cst {dimension_numbers = #tpu.dot_dimension_numbers<[1], [0], [0], [1], [0, 0, 1, 1], [], []>} : vector<16x32xf32>, vector<32x64xf32>, vector<16x64xf32> -> vector<16x64xf32>
    %c0_3 = arith.constant 0 : index
    %c0_4 = arith.constant 0 : index
    %3 = vector.load %arg2[%c0_3, %c0_4] : memref<1x64xf32, #tpu.memory_space<vmem>>, vector<1x64xf32>
    %4 = vector.broadcast %3 : vector<1x64xf32> to vector<16x64xf32>
    %5 = arith.addf %2, %4 : vector<16x64xf32>
    %cst_5 = arith.constant 5.000000e-01 : f32
    %6 = vector.broadcast %cst_5 : f32 to vector<16x64xf32>
    %7 = arith.mulf %6, %5 : vector<16x64xf32>
    %cst_6 = arith.constant 4.471500e-02 : f32
    %8 = vector.broadcast %cst_6 : f32 to vector<16x64xf32>
    %9 = arith.mulf %8, %5 : vector<16x64xf32>
    %10 = arith.mulf %9, %5 : vector<16x64xf32>
    %11 = arith.mulf %10, %5 : vector<16x64xf32>
    %12 = arith.addf %5, %11 : vector<16x64xf32>
    %cst_7 = arith.constant 0.797884583 : f32
    %13 = vector.broadcast %cst_7 : f32 to vector<16x64xf32>
    %14 = arith.mulf %13, %12 : vector<16x64xf32>
    %15 = math.tanh %14 : vector<16x64xf32>
    %cst_8 = arith.constant 1.000000e+00 : f32
    %16 = vector.broadcast %cst_8 : f32 to vector<16x64xf32>
    %17 = arith.addf %16, %15 : vector<16x64xf32>
    %18 = arith.mulf %7, %17 : vector<16x64xf32>
    %c0_9 = arith.constant 0 : index
    %c0_10 = arith.constant 0 : index
    %19 = vector.load %arg3[%c0_9, %c0_10] : memref<64x32xf32, #tpu.memory_space<vmem>>, vector<64x32xf32>
    %cst_11 = arith.constant dense<0.000000e+00> : vector<16x32xf32>
    %20 = tpu.matmul %18, %19, %cst_11 {dimension_numbers = #tpu.dot_dimension_numbers<[1], [0], [0], [1], [0, 0, 1, 1], [], []>} : vector<16x64xf32>, vector<64x32xf32>, vector<16x32xf32> -> vector<16x32xf32>
    %c0_12 = arith.constant 0 : index
    %c0_13 = arith.constant 0 : index
    %21 = vector.load %arg4[%c0_12, %c0_13] : memref<1x32xf32, #tpu.memory_space<vmem>>, vector<1x32xf32>
    %22 = vector.broadcast %21 : vector<1x32xf32> to vector<16x32xf32>
    %23 = arith.addf %20, %22 : vector<16x32xf32>
    %24 = arith.addf %23, %0 : vector<16x32xf32>
    %c0_14 = arith.constant 0 : index
    %c0_15 = arith.constant 0 : index
    %25 = vector.load %arg5[%c0_14, %c0_15] : memref<1x32xf32, #tpu.memory_space<vmem>>, vector<1x32xf32>
    %c0_16 = arith.constant 0 : index
    %c0_17 = arith.constant 0 : index
    %26 = vector.load %arg6[%c0_16, %c0_17] : memref<1x32xf32, #tpu.memory_space<vmem>>, vector<1x32xf32>
    %cst_18 = arith.constant dense<0.000000e+00> : vector<16xf32>
    %27 = vector.multi_reduction <add>, %24, %cst_18 [1] : vector<16x32xf32> to vector<16xf32>
    %28 = vector.shape_cast %27 : vector<16xf32> to vector<16x1xf32>
    %cst_19 = arith.constant 3.200000e+01 : f32
    %29 = vector.broadcast %cst_19 : f32 to vector<16x1xf32>
    %30 = arith.divf %28, %29 : vector<16x1xf32>
    %31 = vector.broadcast %30 : vector<16x1xf32> to vector<16x32xf32>
    %32 = arith.subf %24, %31 : vector<16x32xf32>
    %33 = arith.mulf %32, %32 : vector<16x32xf32>
    %cst_20 = arith.constant dense<0.000000e+00> : vector<16xf32>
    %34 = vector.multi_reduction <add>, %33, %cst_20 [1] : vector<16x32xf32> to vector<16xf32>
    %35 = vector.shape_cast %34 : vector<16xf32> to vector<16x1xf32>
    %cst_21 = arith.constant 3.200000e+01 : f32
    %36 = vector.broadcast %cst_21 : f32 to vector<16x1xf32>
    %37 = arith.divf %35, %36 : vector<16x1xf32>
    %38 = vector.broadcast %30 : vector<16x1xf32> to vector<16x32xf32>
    %39 = arith.subf %24, %38 : vector<16x32xf32>
    %cst_22 = arith.constant 9.99999996E-13 : f32
    %40 = vector.broadcast %cst_22 : f32 to vector<16x1xf32>
    %41 = arith.addf %37, %40 : vector<16x1xf32>
    %42 = math.rsqrt %41 : vector<16x1xf32>
    %43 = vector.broadcast %42 : vector<16x1xf32> to vector<16x32xf32>
    %44 = arith.mulf %39, %43 : vector<16x32xf32>
    %45 = vector.broadcast %25 : vector<1x32xf32> to vector<16x32xf32>
    %46 = arith.mulf %44, %45 : vector<16x32xf32>
    %47 = vector.broadcast %26 : vector<1x32xf32> to vector<16x32xf32>
    %48 = arith.addf %46, %47 : vector<16x32xf32>
    %c0_23 = arith.constant 0 : index
    %c0_24 = arith.constant 0 : index
    %49 = vector.load %arg7[%c0_23, %c0_24] : memref<16x32xf32, #tpu.memory_space<vmem>>, vector<16x32xf32>
    tpu.vector_store %arg7[%c0_23, %c0_24], %48 {strides = array<i32>} : memref<16x32xf32, #tpu.memory_space<vmem>>, vector<16x32xf32>,
    return
  }
}

module attributes {stable_mosaic.version = 11 : i64} {
  func.func @_cross_attn_block_kernel(%arg0: i32, %arg1: memref<1x8x32xf32, #tpu.memory_space<vmem>>, %arg2: memref<1x8x32xf32, #tpu.memory_space<vmem>>, %arg3: memref<1x8x8xf32, #tpu.memory_space<vmem>>, %arg4: memref<32x32xf32, #tpu.memory_space<vmem>>, %arg5: memref<1x32xf32, #tpu.memory_space<vmem>>, %arg6: memref<32x64xf32, #tpu.memory_space<vmem>>, %arg7: memref<1x64xf32, #tpu.memory_space<vmem>>, %arg8: memref<32x32xf32, #tpu.memory_space<vmem>>, %arg9: memref<1x32xf32, #tpu.memory_space<vmem>>, %arg10: memref<1x32xf32, #tpu.memory_space<vmem>>, %arg11: memref<1x32xf32, #tpu.memory_space<vmem>>, %arg12: memref<1x8x32xf32, #tpu.memory_space<vmem>>) attributes {dimension_semantics = [#tpu.dimension_semantics<parallel>], iteration_bounds = array<i64: 2>, scalar_prefetch = 0 : i64, scratch_operands = 0 : i64, tpu.core_type = #tpu.core_type<tc>, window_params = [{transform_indices = @transform_0, window_bounds = array<i64: 1, 8, 32>}, {transform_indices = @transform_1, window_bounds = array<i64: 1, 8, 32>}, {transform_indices = @transform_2, window_bounds = array<i64: 1, 8, 8>}, {pipeline_mode = #tpu.pipeline_mode<synchronous>, transform_indices = @transform_3, window_bounds = array<i64: 32, 32>}, {pipeline_mode = #tpu.pipeline_mode<synchronous>, transform_indices = @transform_4, window_bounds = array<i64: 1, 32>}, {pipeline_mode = #tpu.pipeline_mode<synchronous>, transform_indices = @transform_5, window_bounds = array<i64: 32, 64>}, {pipeline_mode = #tpu.pipeline_mode<synchronous>, transform_indices = @transform_6, window_bounds = array<i64: 1, 64>}, {pipeline_mode = #tpu.pipeline_mode<synchronous>, transform_indices = @transform_7, window_bounds = array<i64: 32, 32>}, {pipeline_mode = #tpu.pipeline_mode<synchronous>, transform_indices = @transform_8, window_bounds = array<i64: 1, 32>}, {pipeline_mode = #tpu.pipeline_mode<synchronous>, transform_indices = @transform_9, window_bounds = array<i64: 1, 32>}, {pipeline_mode = #tpu.pipeline_mode<synchronous>, transform_indices = @transform_10, window_bounds = array<i64: 1, 32>}, {transform_indices = @transform_11, window_bounds = array<i64: 1, 8, 32>}]} {
    %c0 = arith.constant 0 : index
    %c0_0 = arith.constant 0 : index
    %c0_1 = arith.constant 0 : index
    %0 = vector.load %arg1[%c0, %c0_0, %c0_1] : memref<1x8x32xf32, #tpu.memory_space<vmem>>, vector<1x8x32xf32>
    %1 = vector.shape_cast %0 : vector<1x8x32xf32> to vector<8x32xf32>
    %c0_2 = arith.constant 0 : index
    %c0_3 = arith.constant 0 : index
    %c0_4 = arith.constant 0 : index
    %2 = vector.load %arg2[%c0_2, %c0_3, %c0_4] : memref<1x8x32xf32, #tpu.memory_space<vmem>>, vector<1x8x32xf32>
    %3 = vector.shape_cast %2 : vector<1x8x32xf32> to vector<8x32xf32>
    %c0_5 = arith.constant 0 : index
    %c0_6 = arith.constant 0 : index
    %4 = vector.load %arg4[%c0_5, %c0_6] : memref<32x32xf32, #tpu.memory_space<vmem>>, vector<32x32xf32>
    %cst = arith.constant dense<0.000000e+00> : vector<8x32xf32>
    %5 = tpu.matmul %1, %4, %cst {dimension_numbers = #tpu.dot_dimension_numbers<[1], [0], [0], [1], [0, 0, 1, 1], [], []>} : vector<8x32xf32>, vector<32x32xf32>, vector<8x32xf32> -> vector<8x32xf32>
    %c0_7 = arith.constant 0 : index
    %c0_8 = arith.constant 0 : index
    %6 = vector.load %arg5[%c0_7, %c0_8] : memref<1x32xf32, #tpu.memory_space<vmem>>, vector<1x32xf32>
    %7 = vector.broadcast %6 : vector<1x32xf32> to vector<8x32xf32>
    %8 = arith.addf %5, %7 : vector<8x32xf32>
    %c0_9 = arith.constant 0 : index
    %c0_10 = arith.constant 0 : index
    %9 = vector.load %arg6[%c0_9, %c0_10] : memref<32x64xf32, #tpu.memory_space<vmem>>, vector<32x64xf32>
    %cst_11 = arith.constant dense<0.000000e+00> : vector<8x64xf32>
    %10 = tpu.matmul %3, %9, %cst_11 {dimension_numbers = #tpu.dot_dimension_numbers<[1], [0], [0], [1], [0, 0, 1, 1], [], []>} : vector<8x32xf32>, vector<32x64xf32>, vector<8x64xf32> -> vector<8x64xf32>
    %c0_12 = arith.constant 0 : index
    %c0_13 = arith.constant 0 : index
    %11 = vector.load %arg7[%c0_12, %c0_13] : memref<1x64xf32, #tpu.memory_space<vmem>>, vector<1x64xf32>
    %12 = vector.broadcast %11 : vector<1x64xf32> to vector<8x64xf32>
    %13 = arith.addf %10, %12 : vector<8x64xf32>
    %14 = vector.extract_strided_slice %13 {offsets = [0, 0], sizes = [8, 32], strides = [1, 1]} : vector<8x64xf32> to vector<8x32xf32>
    %15 = vector.extract_strided_slice %13 {offsets = [0, 32], sizes = [8, 32], strides = [1, 1]} : vector<8x64xf32> to vector<8x32xf32>
    %c0_14 = arith.constant 0 : index
    %c0_15 = arith.constant 0 : index
    %c0_16 = arith.constant 0 : index
    %16 = vector.load %arg3[%c0_14, %c0_15, %c0_16] : memref<1x8x8xf32, #tpu.memory_space<vmem>>, vector<1x8x8xf32>
    %17 = vector.shape_cast %16 : vector<1x8x8xf32> to vector<8x8xf32>
    %18 = vector.extract_strided_slice %8 {offsets = [0, 0], sizes = [8, 8], strides = [1, 1]} : vector<8x32xf32> to vector<8x8xf32>
    %19 = vector.extract_strided_slice %14 {offsets = [0, 0], sizes = [8, 8], strides = [1, 1]} : vector<8x32xf32> to vector<8x8xf32>
    %cst_17 = arith.constant dense<0.000000e+00> : vector<8x8xf32>
    %20 = tpu.matmul %18, %19, %cst_17 {dimension_numbers = #tpu.dot_dimension_numbers<[1], [1], [0], [0], [0, 0, 1, 0], [], []>} : vector<8x8xf32>, vector<8x8xf32>, vector<8x8xf32> -> vector<8x8xf32>
    %cst_18 = arith.constant 0.353553385 : f32
    %21 = vector.broadcast %cst_18 : f32 to vector<8x8xf32>
    %22 = arith.mulf %20, %21 : vector<8x8xf32>
    %23 = arith.addf %22, %17 : vector<8x8xf32>
    %cst_19 = arith.constant dense<0xFF800000> : vector<8xf32>
    %24 = vector.multi_reduction <maximumf>, %23, %cst_19 [1] : vector<8x8xf32> to vector<8xf32>
    %25 = vector.shape_cast %24 : vector<8xf32> to vector<8x1xf32>
    %26 = vector.broadcast %25 : vector<8x1xf32> to vector<8x8xf32>
    %27 = arith.subf %23, %26 : vector<8x8xf32>
    %28 = math.exp %27 : vector<8x8xf32>
    %cst_20 = arith.constant dense<0.000000e+00> : vector<8xf32>
    %29 = vector.multi_reduction <add>, %28, %cst_20 [1] : vector<8x8xf32> to vector<8xf32>
    %30 = vector.shape_cast %29 : vector<8xf32> to vector<8x1xf32>
    %31 = tpu.reciprocal %30 {approx = true} : vector<8x1xf32> -> vector<8x1xf32>
    %32 = vector.broadcast %31 : vector<8x1xf32> to vector<8x8xf32>
    %33 = arith.mulf %28, %32 : vector<8x8xf32>
    %34 = vector.extract_strided_slice %15 {offsets = [0, 0], sizes = [8, 8], strides = [1, 1]} : vector<8x32xf32> to vector<8x8xf32>
    %cst_21 = arith.constant dense<0.000000e+00> : vector<8x8xf32>
    %35 = tpu.matmul %33, %34, %cst_21 {dimension_numbers = #tpu.dot_dimension_numbers<[1], [0], [0], [1], [0, 0, 1, 1], [], []>} : vector<8x8xf32>, vector<8x8xf32>, vector<8x8xf32> -> vector<8x8xf32>
    %36 = vector.extract_strided_slice %8 {offsets = [0, 8], sizes = [8, 8], strides = [1, 1]} : vector<8x32xf32> to vector<8x8xf32>
    %37 = vector.extract_strided_slice %14 {offsets = [0, 8], sizes = [8, 8], strides = [1, 1]} : vector<8x32xf32> to vector<8x8xf32>
    %cst_22 = arith.constant dense<0.000000e+00> : vector<8x8xf32>
    %38 = tpu.matmul %36, %37, %cst_22 {dimension_numbers = #tpu.dot_dimension_numbers<[1], [1], [0], [0], [0, 0, 1, 0], [], []>} : vector<8x8xf32>, vector<8x8xf32>, vector<8x8xf32> -> vector<8x8xf32>
    %cst_23 = arith.constant 0.353553385 : f32
    %39 = vector.broadcast %cst_23 : f32 to vector<8x8xf32>
    %40 = arith.mulf %38, %39 : vector<8x8xf32>
    %41 = arith.addf %40, %17 : vector<8x8xf32>
    %cst_24 = arith.constant dense<0xFF800000> : vector<8xf32>
    %42 = vector.multi_reduction <maximumf>, %41, %cst_24 [1] : vector<8x8xf32> to vector<8xf32>
    %43 = vector.shape_cast %42 : vector<8xf32> to vector<8x1xf32>
    %44 = vector.broadcast %43 : vector<8x1xf32> to vector<8x8xf32>
    %45 = arith.subf %41, %44 : vector<8x8xf32>
    %46 = math.exp %45 : vector<8x8xf32>
    %cst_25 = arith.constant dense<0.000000e+00> : vector<8xf32>
    %47 = vector.multi_reduction <add>, %46, %cst_25 [1] : vector<8x8xf32> to vector<8xf32>
    %48 = vector.shape_cast %47 : vector<8xf32> to vector<8x1xf32>
    %49 = tpu.reciprocal %48 {approx = true} : vector<8x1xf32> -> vector<8x1xf32>
    %50 = vector.broadcast %49 : vector<8x1xf32> to vector<8x8xf32>
    %51 = arith.mulf %46, %50 : vector<8x8xf32>
    %52 = vector.extract_strided_slice %15 {offsets = [0, 8], sizes = [8, 8], strides = [1, 1]} : vector<8x32xf32> to vector<8x8xf32>
    %cst_26 = arith.constant dense<0.000000e+00> : vector<8x8xf32>
    %53 = tpu.matmul %51, %52, %cst_26 {dimension_numbers = #tpu.dot_dimension_numbers<[1], [0], [0], [1], [0, 0, 1, 1], [], []>} : vector<8x8xf32>, vector<8x8xf32>, vector<8x8xf32> -> vector<8x8xf32>
    %54 = vector.extract_strided_slice %8 {offsets = [0, 16], sizes = [8, 8], strides = [1, 1]} : vector<8x32xf32> to vector<8x8xf32>
    %55 = vector.extract_strided_slice %14 {offsets = [0, 16], sizes = [8, 8], strides = [1, 1]} : vector<8x32xf32> to vector<8x8xf32>
    %cst_27 = arith.constant dense<0.000000e+00> : vector<8x8xf32>
    %56 = tpu.matmul %54, %55, %cst_27 {dimension_numbers = #tpu.dot_dimension_numbers<[1], [1], [0], [0], [0, 0, 1, 0], [], []>} : vector<8x8xf32>, vector<8x8xf32>, vector<8x8xf32> -> vector<8x8xf32>
    %cst_28 = arith.constant 0.353553385 : f32
    %57 = vector.broadcast %cst_28 : f32 to vector<8x8xf32>
    %58 = arith.mulf %56, %57 : vector<8x8xf32>
    %59 = arith.addf %58, %17 : vector<8x8xf32>
    %cst_29 = arith.constant dense<0xFF800000> : vector<8xf32>
    %60 = vector.multi_reduction <maximumf>, %59, %cst_29 [1] : vector<8x8xf32> to vector<8xf32>
    %61 = vector.shape_cast %60 : vector<8xf32> to vector<8x1xf32>
    %62 = vector.broadcast %61 : vector<8x1xf32> to vector<8x8xf32>
    %63 = arith.subf %59, %62 : vector<8x8xf32>
    %64 = math.exp %63 : vector<8x8xf32>
    %cst_30 = arith.constant dense<0.000000e+00> : vector<8xf32>
    %65 = vector.multi_reduction <add>, %64, %cst_30 [1] : vector<8x8xf32> to vector<8xf32>
    %66 = vector.shape_cast %65 : vector<8xf32> to vector<8x1xf32>
    %67 = tpu.reciprocal %66 {approx = true} : vector<8x1xf32> -> vector<8x1xf32>
    %68 = vector.broadcast %67 : vector<8x1xf32> to vector<8x8xf32>
    %69 = arith.mulf %64, %68 : vector<8x8xf32>
    %70 = vector.extract_strided_slice %15 {offsets = [0, 16], sizes = [8, 8], strides = [1, 1]} : vector<8x32xf32> to vector<8x8xf32>
    %cst_31 = arith.constant dense<0.000000e+00> : vector<8x8xf32>
    %71 = tpu.matmul %69, %70, %cst_31 {dimension_numbers = #tpu.dot_dimension_numbers<[1], [0], [0], [1], [0, 0, 1, 1], [], []>} : vector<8x8xf32>, vector<8x8xf32>, vector<8x8xf32> -> vector<8x8xf32>
    %72 = vector.extract_strided_slice %8 {offsets = [0, 24], sizes = [8, 8], strides = [1, 1]} : vector<8x32xf32> to vector<8x8xf32>
    %73 = vector.extract_strided_slice %14 {offsets = [0, 24], sizes = [8, 8], strides = [1, 1]} : vector<8x32xf32> to vector<8x8xf32>
    %cst_32 = arith.constant dense<0.000000e+00> : vector<8x8xf32>
    %74 = tpu.matmul %72, %73, %cst_32 {dimension_numbers = #tpu.dot_dimension_numbers<[1], [1], [0], [0], [0, 0, 1, 0], [], []>} : vector<8x8xf32>, vector<8x8xf32>, vector<8x8xf32> -> vector<8x8xf32>
    %cst_33 = arith.constant 0.353553385 : f32
    %75 = vector.broadcast %cst_33 : f32 to vector<8x8xf32>
    %76 = arith.mulf %74, %75 : vector<8x8xf32>
    %77 = arith.addf %76, %17 : vector<8x8xf32>
    %cst_34 = arith.constant dense<0xFF800000> : vector<8xf32>
    %78 = vector.multi_reduction <maximumf>, %77, %cst_34 [1] : vector<8x8xf32> to vector<8xf32>
    %79 = vector.shape_cast %78 : vector<8xf32> to vector<8x1xf32>
    %80 = vector.broadcast %79 : vector<8x1xf32> to vector<8x8xf32>
    %81 = arith.subf %77, %80 : vector<8x8xf32>
    %82 = math.exp %81 : vector<8x8xf32>
    %cst_35 = arith.constant dense<0.000000e+00> : vector<8xf32>
    %83 = vector.multi_reduction <add>, %82, %cst_35 [1] : vector<8x8xf32> to vector<8xf32>
    %84 = vector.shape_cast %83 : vector<8xf32> to vector<8x1xf32>
    %85 = tpu.reciprocal %84 {approx = true} : vector<8x1xf32> -> vector<8x1xf32>
    %86 = vector.broadcast %85 : vector<8x1xf32> to vector<8x8xf32>
    %87 = arith.mulf %82, %86 : vector<8x8xf32>
    %88 = vector.extract_strided_slice %15 {offsets = [0, 24], sizes = [8, 8], strides = [1, 1]} : vector<8x32xf32> to vector<8x8xf32>
    %cst_36 = arith.constant dense<0.000000e+00> : vector<8x8xf32>
    %89 = tpu.matmul %87, %88, %cst_36 {dimension_numbers = #tpu.dot_dimension_numbers<[1], [0], [0], [1], [0, 0, 1, 1], [], []>} : vector<8x8xf32>, vector<8x8xf32>, vector<8x8xf32> -> vector<8x8xf32>
    %90 = tpu.concatenate %35, %53, %71, %89 in 1 : vector<8x8xf32>, vector<8x8xf32>, vector<8x8xf32>, vector<8x8xf32> -> vector<8x32xf32>
    %c0_37 = arith.constant 0 : index
    %c0_38 = arith.constant 0 : index
    %91 = vector.load %arg8[%c0_37, %c0_38] : memref<32x32xf32, #tpu.memory_space<vmem>>, vector<32x32xf32>
    %cst_39 = arith.constant dense<0.000000e+00> : vector<8x32xf32>
    %92 = tpu.matmul %90, %91, %cst_39 {dimension_numbers = #tpu.dot_dimension_numbers<[1], [0], [0], [1], [0, 0, 1, 1], [], []>} : vector<8x32xf32>, vector<32x32xf32>, vector<8x32xf32> -> vector<8x32xf32>
    %c0_40 = arith.constant 0 : index
    %c0_41 = arith.constant 0 : index
    %93 = vector.load %arg9[%c0_40, %c0_41] : memref<1x32xf32, #tpu.memory_space<vmem>>, vector<1x32xf32>
    %94 = vector.broadcast %93 : vector<1x32xf32> to vector<8x32xf32>
    %95 = arith.addf %92, %94 : vector<8x32xf32>
    %96 = arith.addf %95, %1 : vector<8x32xf32>
    %c0_42 = arith.constant 0 : index
    %c0_43 = arith.constant 0 : index
    %97 = vector.load %arg10[%c0_42, %c0_43] : memref<1x32xf32, #tpu.memory_space<vmem>>, vector<1x32xf32>
    %c0_44 = arith.constant 0 : index
    %c0_45 = arith.constant 0 : index
    %98 = vector.load %arg11[%c0_44, %c0_45] : memref<1x32xf32, #tpu.memory_space<vmem>>, vector<1x32xf32>
    %cst_46 = arith.constant dense<0.000000e+00> : vector<8xf32>
    %99 = vector.multi_reduction <add>, %96, %cst_46 [1] : vector<8x32xf32> to vector<8xf32>
    %100 = vector.shape_cast %99 : vector<8xf32> to vector<8x1xf32>
    %cst_47 = arith.constant 3.200000e+01 : f32
    %101 = vector.broadcast %cst_47 : f32 to vector<8x1xf32>
    %102 = arith.divf %100, %101 : vector<8x1xf32>
    %103 = vector.broadcast %102 : vector<8x1xf32> to vector<8x32xf32>
    %104 = arith.subf %96, %103 : vector<8x32xf32>
    %105 = arith.mulf %104, %104 : vector<8x32xf32>
    %cst_48 = arith.constant dense<0.000000e+00> : vector<8xf32>
    %106 = vector.multi_reduction <add>, %105, %cst_48 [1] : vector<8x32xf32> to vector<8xf32>
    %107 = vector.shape_cast %106 : vector<8xf32> to vector<8x1xf32>
    %cst_49 = arith.constant 3.200000e+01 : f32
    %108 = vector.broadcast %cst_49 : f32 to vector<8x1xf32>
    %109 = arith.divf %107, %108 : vector<8x1xf32>
    %110 = vector.broadcast %102 : vector<8x1xf32> to vector<8x32xf32>
    %111 = arith.subf %96, %110 : vector<8x32xf32>
    %cst_50 = arith.constant 9.99999996E-13 : f32
    %112 = vector.broadcast %cst_50 : f32 to vector<8x1xf32>
    %113 = arith.addf %109, %112 : vector<8x1xf32>
    %114 = math.rsqrt %113 : vector<8x1xf32>
    %115 = vector.broadcast %114 : vector<8x1xf32> to vector<8x32xf32>
    %116 = arith.mulf %111, %115 : vector<8x32xf32>
    %117 = vector.broadcast %97 : vector<1x32xf32> to vector<8x32xf32>
    %118 = arith.mulf %116, %117 : vector<8x32xf32>
    %119 = vector.broadcast %98 : vector<1x32xf32> to vector<8x32xf32>
    %120 = arith.addf %118, %119 : vector<8x32xf32>
    %c0_51 = arith.constant 0 : index
    %c0_52 = arith.constant 0 : index
    %c0_53 = arith.constant 0 : index
    %121 = vector.load %arg12[%c0_51, %c0_52, %c0_53] : memref<1x8x32xf32, #tpu.memory_space<vmem>>, vector<1x8x32xf32>
    %122 = vector.shape_cast %121 : vector<1x8x32xf32> to vector<8x32xf32>
    %123 = vector.shape_cast %120 : vector<8x32xf32> to vector<1x8x32xf32>
    tpu.vector_store %arg12[%c0_51, %c0_52, %c0_53], %123 {strides = array<i32>} : memref<1x8x32xf32, #tpu.memory_space<vmem>>, vector<1x8x32xf32>,
    return
  }
  func.func @transform_0(%arg0: i32) -> (i32, i32, i32) {
    %c0_i32 = arith.constant 0 : i32
    %c0_i32_0 = arith.constant 0 : i32
    %c0_i32_1 = arith.constant 0 : i32
    return %arg0, %c0_i32, %c0_i32_0 : i32, i32, i32
  }
  func.func @transform_1(%arg0: i32) -> (i32, i32, i32) {
    %c0_i32 = arith.constant 0 : i32
    %c0_i32_0 = arith.constant 0 : i32
    %c0_i32_1 = arith.constant 0 : i32
    return %arg0, %c0_i32, %c0_i32_0 : i32, i32, i32
  }
  func.func @transform_2(%arg0: i32) -> (i32, i32, i32) {
    %c0_i32 = arith.constant 0 : i32
    %c0_i32_0 = arith.constant 0 : i32
    %c0_i32_1 = arith.constant 0 : i32
    return %arg0, %c0_i32, %c0_i32_0 : i32, i32, i32
  }
  func.func @transform_3(%arg0: i32) -> (i32, i32) {
    %c0_i32 = arith.constant 0 : i32
    %c0_i32_0 = arith.constant 0 : i32
    %c0_i32_1 = arith.constant 0 : i32
    return %c0_i32, %c0_i32_0 : i32, i32
  }
  func.func @transform_4(%arg0: i32) -> (i32, i32) {
    %c0_i32 = arith.constant 0 : i32
    %c0_i32_0 = arith.constant 0 : i32
    %c0_i32_1 = arith.constant 0 : i32
    return %c0_i32, %c0_i32_0 : i32, i32
  }
  func.func @transform_5(%arg0: i32) -> (i32, i32) {
    %c0_i32 = arith.constant 0 : i32
    %c0_i32_0 = arith.constant 0 : i32
    %c0_i32_1 = arith.constant 0 : i32
    return %c0_i32, %c0_i32_0 : i32, i32
  }
  func.func @transform_6(%arg0: i32) -> (i32, i32) {
    %c0_i32 = arith.constant 0 : i32
    %c0_i32_0 = arith.constant 0 : i32
    %c0_i32_1 = arith.constant 0 : i32
    return %c0_i32, %c0_i32_0 : i32, i32
  }
  func.func @transform_7(%arg0: i32) -> (i32, i32) {
    %c0_i32 = arith.constant 0 : i32
    %c0_i32_0 = arith.constant 0 : i32
    %c0_i32_1 = arith.constant 0 : i32
    return %c0_i32, %c0_i32_0 : i32, i32
  }
  func.func @transform_8(%arg0: i32) -> (i32, i32) {
    %c0_i32 = arith.constant 0 : i32
    %c0_i32_0 = arith.constant 0 : i32
    %c0_i32_1 = arith.constant 0 : i32
    return %c0_i32, %c0_i32_0 : i32, i32
  }
  func.func @transform_9(%arg0: i32) -> (i32, i32) {
    %c0_i32 = arith.constant 0 : i32
    %c0_i32_0 = arith.constant 0 : i32
    %c0_i32_1 = arith.constant 0 : i32
    return %c0_i32, %c0_i32_0 : i32, i32
  }
  func.func @transform_10(%arg0: i32) -> (i32, i32) {
    %c0_i32 = arith.constant 0 : i32
    %c0_i32_0 = arith.constant 0 : i32
    %c0_i32_1 = arith.constant 0 : i32
    return %c0_i32, %c0_i32_0 : i32, i32
  }
  func.func @transform_11(%arg0: i32) -> (i32, i32, i32) {
    %c0_i32 = arith.constant 0 : i32
    %c0_i32_0 = arith.constant 0 : i32
    %c0_i32_1 = arith.constant 0 : i32
    return %arg0, %c0_i32, %c0_i32_0 : i32, i32, i32
  }
}

module attributes {stable_mosaic.version = 11 : i64} {
  func.func @_lm_head_kernel(%arg0: memref<16x32xf32, #tpu.memory_space<vmem>>, %arg1: memref<32x32xf32, #tpu.memory_space<vmem>>, %arg2: memref<1x32xf32, #tpu.memory_space<vmem>>, %arg3: memref<1x32xf32, #tpu.memory_space<vmem>>, %arg4: memref<1x32xf32, #tpu.memory_space<vmem>>, %arg5: memref<32x64xf32, #tpu.memory_space<vmem>>, %arg6: memref<1x64xf32, #tpu.memory_space<vmem>>, %arg7: memref<16x64xf32, #tpu.memory_space<vmem>>) attributes {dimension_semantics = [], scalar_prefetch = 0 : i64, scratch_operands = 0 : i64, tpu.core_type = #tpu.core_type<tc>} {
    %c0 = arith.constant 0 : index
    %c0_0 = arith.constant 0 : index
    %0 = vector.load %arg0[%c0, %c0_0] : memref<16x32xf32, #tpu.memory_space<vmem>>, vector<16x32xf32>
    %c0_1 = arith.constant 0 : index
    %c0_2 = arith.constant 0 : index
    %1 = vector.load %arg1[%c0_1, %c0_2] : memref<32x32xf32, #tpu.memory_space<vmem>>, vector<32x32xf32>
    %cst = arith.constant dense<0.000000e+00> : vector<16x32xf32>
    %2 = tpu.matmul %0, %1, %cst {dimension_numbers = #tpu.dot_dimension_numbers<[1], [0], [0], [1], [0, 0, 1, 1], [], []>} : vector<16x32xf32>, vector<32x32xf32>, vector<16x32xf32> -> vector<16x32xf32>
    %c0_3 = arith.constant 0 : index
    %c0_4 = arith.constant 0 : index
    %3 = vector.load %arg2[%c0_3, %c0_4] : memref<1x32xf32, #tpu.memory_space<vmem>>, vector<1x32xf32>
    %4 = vector.broadcast %3 : vector<1x32xf32> to vector<16x32xf32>
    %5 = arith.addf %2, %4 : vector<16x32xf32>
    %cst_5 = arith.constant 5.000000e-01 : f32
    %6 = vector.broadcast %cst_5 : f32 to vector<16x32xf32>
    %7 = arith.mulf %6, %5 : vector<16x32xf32>
    %cst_6 = arith.constant 4.471500e-02 : f32
    %8 = vector.broadcast %cst_6 : f32 to vector<16x32xf32>
    %9 = arith.mulf %8, %5 : vector<16x32xf32>
    %10 = arith.mulf %9, %5 : vector<16x32xf32>
    %11 = arith.mulf %10, %5 : vector<16x32xf32>
    %12 = arith.addf %5, %11 : vector<16x32xf32>
    %cst_7 = arith.constant 0.797884583 : f32
    %13 = vector.broadcast %cst_7 : f32 to vector<16x32xf32>
    %14 = arith.mulf %13, %12 : vector<16x32xf32>
    %15 = math.tanh %14 : vector<16x32xf32>
    %cst_8 = arith.constant 1.000000e+00 : f32
    %16 = vector.broadcast %cst_8 : f32 to vector<16x32xf32>
    %17 = arith.addf %16, %15 : vector<16x32xf32>
    %18 = arith.mulf %7, %17 : vector<16x32xf32>
    %c0_9 = arith.constant 0 : index
    %c0_10 = arith.constant 0 : index
    %19 = vector.load %arg3[%c0_9, %c0_10] : memref<1x32xf32, #tpu.memory_space<vmem>>, vector<1x32xf32>
    %c0_11 = arith.constant 0 : index
    %c0_12 = arith.constant 0 : index
    %20 = vector.load %arg4[%c0_11, %c0_12] : memref<1x32xf32, #tpu.memory_space<vmem>>, vector<1x32xf32>
    %cst_13 = arith.constant dense<0.000000e+00> : vector<16xf32>
    %21 = vector.multi_reduction <add>, %18, %cst_13 [1] : vector<16x32xf32> to vector<16xf32>
    %22 = vector.shape_cast %21 : vector<16xf32> to vector<16x1xf32>
    %cst_14 = arith.constant 3.200000e+01 : f32
    %23 = vector.broadcast %cst_14 : f32 to vector<16x1xf32>
    %24 = arith.divf %22, %23 : vector<16x1xf32>
    %25 = vector.broadcast %24 : vector<16x1xf32> to vector<16x32xf32>
    %26 = arith.subf %18, %25 : vector<16x32xf32>
    %27 = arith.mulf %26, %26 : vector<16x32xf32>
    %cst_15 = arith.constant dense<0.000000e+00> : vector<16xf32>
    %28 = vector.multi_reduction <add>, %27, %cst_15 [1] : vector<16x32xf32> to vector<16xf32>
    %29 = vector.shape_cast %28 : vector<16xf32> to vector<16x1xf32>
    %cst_16 = arith.constant 3.200000e+01 : f32
    %30 = vector.broadcast %cst_16 : f32 to vector<16x1xf32>
    %31 = arith.divf %29, %30 : vector<16x1xf32>
    %32 = vector.broadcast %24 : vector<16x1xf32> to vector<16x32xf32>
    %33 = arith.subf %18, %32 : vector<16x32xf32>
    %cst_17 = arith.constant 9.99999996E-13 : f32
    %34 = vector.broadcast %cst_17 : f32 to vector<16x1xf32>
    %35 = arith.addf %31, %34 : vector<16x1xf32>
    %36 = math.rsqrt %35 : vector<16x1xf32>
    %37 = vector.broadcast %36 : vector<16x1xf32> to vector<16x32xf32>
    %38 = arith.mulf %33, %37 : vector<16x32xf32>
    %39 = vector.broadcast %19 : vector<1x32xf32> to vector<16x32xf32>
    %40 = arith.mulf %38, %39 : vector<16x32xf32>
    %41 = vector.broadcast %20 : vector<1x32xf32> to vector<16x32xf32>
    %42 = arith.addf %40, %41 : vector<16x32xf32>
    %c0_18 = arith.constant 0 : index
    %c0_19 = arith.constant 0 : index
    %43 = vector.load %arg5[%c0_18, %c0_19] : memref<32x64xf32, #tpu.memory_space<vmem>>, vector<32x64xf32>
    %cst_20 = arith.constant dense<0.000000e+00> : vector<16x64xf32>
    %44 = tpu.matmul %42, %43, %cst_20 {dimension_numbers = #tpu.dot_dimension_numbers<[1], [0], [0], [1], [0, 0, 1, 1], [], []>} : vector<16x32xf32>, vector<32x64xf32>, vector<16x64xf32> -> vector<16x64xf32>
    %c0_21 = arith.constant 0 : index
    %c0_22 = arith.constant 0 : index
    %45 = vector.load %arg6[%c0_21, %c0_22] : memref<1x64xf32, #tpu.memory_space<vmem>>, vector<1x64xf32>
    %46 = vector.broadcast %45 : vector<1x64xf32> to vector<16x64xf32>
    %47 = arith.addf %44, %46 : vector<16x64xf32>
    %c0_23 = arith.constant 0 : index
    %c0_24 = arith.constant 0 : index
    %48 = vector.load %arg7[%c0_23, %c0_24] : memref<16x64xf32, #tpu.memory_space<vmem>>, vector<16x64xf32>
    tpu.vector_store %arg7[%c0_23, %c0_24], %47 {strides = array<i32>} : memref<16x64xf32, #tpu.memory_space<vmem>>, vector<16x64xf32>,
    return
  }
}

module attributes {stable_mosaic.version = 11 : i64} {
  func.func @_xent_kernel(%arg0: memref<16x64xf32, #tpu.memory_space<vmem>>, %arg1: memref<16x1xi32, #tpu.memory_space<vmem>>, %arg2: memref<1x1xf32, #tpu.memory_space<vmem>>) attributes {dimension_semantics = [], scalar_prefetch = 0 : i64, scratch_operands = 0 : i64, tpu.core_type = #tpu.core_type<tc>} {
    %c0 = arith.constant 0 : index
    %c0_0 = arith.constant 0 : index
    %0 = vector.load %arg0[%c0, %c0_0] : memref<16x64xf32, #tpu.memory_space<vmem>>, vector<16x64xf32>
    %c0_1 = arith.constant 0 : index
    %c0_2 = arith.constant 0 : index
    %1 = vector.load %arg1[%c0_1, %c0_2] : memref<16x1xi32, #tpu.memory_space<vmem>>, vector<16x1xi32>
    %cst = arith.constant dense<0xFF800000> : vector<16xf32>
    %2 = vector.multi_reduction <maximumf>, %0, %cst [1] : vector<16x64xf32> to vector<16xf32>
    %3 = vector.shape_cast %2 : vector<16xf32> to vector<16x1xf32>
    %4 = vector.broadcast %3 : vector<16x1xf32> to vector<16x64xf32>
    %5 = arith.subf %0, %4 : vector<16x64xf32>
    %6 = math.exp %5 : vector<16x64xf32>
    %cst_3 = arith.constant dense<0.000000e+00> : vector<16xf32>
    %7 = vector.multi_reduction <add>, %6, %cst_3 [1] : vector<16x64xf32> to vector<16xf32>
    %8 = vector.shape_cast %7 : vector<16xf32> to vector<16x1xf32>
    %9 = math.log %8 : vector<16x1xf32>
    %10 = arith.addf %9, %3 : vector<16x1xf32>
    %11 = tpu.iota {dimensions = array<i32: 1>} : vector<16x64xi32>
    %12 = vector.broadcast %1 : vector<16x1xi32> to vector<16x64xi32>
    %13 = arith.cmpi eq, %11, %12 : vector<16x64xi32>
    %cst_4 = arith.constant 0.000000e+00 : f32
    %14 = vector.broadcast %cst_4 : f32 to vector<16x64xf32>
    %15 = arith.select %13, %0, %14 : vector<16x64xi1>, vector<16x64xf32>
    %cst_5 = arith.constant dense<0.000000e+00> : vector<16xf32>
    %16 = vector.multi_reduction <add>, %15, %cst_5 [1] : vector<16x64xf32> to vector<16xf32>
    %17 = vector.shape_cast %16 : vector<16xf32> to vector<16x1xf32>
    %18 = arith.subf %10, %17 : vector<16x1xf32>
    %c-100_i32 = arith.constant -100 : i32
    %19 = vector.broadcast %c-100_i32 : i32 to vector<16x1xi32>
    %20 = arith.cmpi ne, %1, %19 : vector<16x1xi32>
    %21 = arith.extui %20 : vector<16x1xi1> to vector<16x1xi32>
    %22 = arith.sitofp %21 : vector<16x1xi32> to vector<16x1xf32>
    %23 = arith.mulf %18, %22 : vector<16x1xf32>
    %cst_6 = arith.constant dense<0.000000e+00> : vector<1xf32>
    %24 = vector.multi_reduction <add>, %23, %cst_6 [0] : vector<16x1xf32> to vector<1xf32>
    %25 = vector.shape_cast %24 : vector<1xf32> to vector<1x1xf32>
    %cst_7 = arith.constant dense<0.000000e+00> : vector<1xf32>
    %26 = vector.multi_reduction <add>, %22, %cst_7 [0] : vector<16x1xf32> to vector<1xf32>
    %27 = vector.shape_cast %26 : vector<1xf32> to vector<1x1xf32>
    %cst_8 = arith.constant 1.000000e+00 : f32
    %28 = vector.broadcast %cst_8 : f32 to vector<1x1xf32>
    %29 = arith.maximumf %27, %28 : vector<1x1xf32>
    %30 = arith.divf %25, %29 : vector<1x1xf32>
    %c0_9 = arith.constant 0 : index
    %c0_10 = arith.constant 0 : index
    %31 = vector.load %arg2[%c0_9, %c0_10] : memref<1x1xf32, #tpu.memory_space<vmem>>, vector<1x1xf32>
    tpu.vector_store %arg2[%c0_9, %c0_10], %30 {strides = array<i32>} : memref<1x1xf32, #tpu.memory_space<vmem>>, vector<1x1xf32>,
    return
  }
}

</mosaic_0001>

<bundles_post_ra>
// kernel: bert2bert_forward.9
= control target key start
LH: loop header
LB: loop body
LE: loop exit
PB: predicated region body
PF: predicated region fallthrough
CT: control target
= control target key end

     0   :  { %vm18_vm0 = vcmask 261120   ;;  %s118_s0 = inlined_call_operand.vmem [shape: f32[16,32], index: 0, kind: input, shape index: {}]   ;;  %s119_s1 = inlined_call_operand.vmem [shape: f32[1,32], index: 1, kind: input, shape index: {}]   ;;  %s120_s2 = inlined_call_operand.vmem [shape: f32[1,32], index: 2, kind: input, shape index: {}]   ;;  %s121_s3 = inlined_call_operand.vmem [shape: f32[16,32], index: 3, kind: output, shape index: {}]  }
   0x1   :  { %v14_v0 = vld [vmem:[%s118_s0] sm:$0xff]  ;;  %v15_v1 = vld [vmem:[%s118_s0 + $0x8] sm:$0xff] }
   0x2   :  { %v19_v2 = vsel %vm18_vm0, %v14_v0, 0.0  ;;  %v22_v3 = vsel %vm18_vm0, %v15_v1, 0.0  ;;  %v68_v21 = vld [vmem:[%s119_s1] ss:$0 sm:$0xff] }
   0x3   :  { %20 = vadd.xlane.f32.xlu0 %v19_v2  ;;  %v69_v23 = vld [vmem:[%s120_s2] ss:$0 sm:$0xff] }
   0x7   :  { %23 = vadd.xlane.f32.xlu0 %v22_v3 }
  0x90   :  { %v21_v4 = vpop.xlane.xlu0 %20 }
  0x91   :  { %v26_v5 = vmul.f32 0.03125, %v21_v4 }
  0x93   :  { %v28_v6 = vsub.f32 %v14_v0, %v26_v5 }
  0x94   :  { %v24_v7 = vpop.xlane.xlu0 %23 }
  0x95   :  { %v27_v8 = vmul.f32 0.03125, %v24_v7  ;;  %v30_v9 = vmul.f32 %v28_v6, %v28_v6 }
  0x97   :  { %v29_v10 = vsub.f32 %v15_v1, %v27_v8  ;;  %v32_v11 = vsel %vm18_vm0, %v30_v9, 0.0 }
  0x98   :  { %33 = vadd.xlane.f32.xlu1 %v32_v11 }
  0x99   :  { %v31_v12 = vmul.f32 %v29_v10, %v29_v10 }
  0x9b   :  { %v35_v13 = vsel %vm18_vm0, %v31_v12, 0.0 }
  0x9c   :  { %36 = vadd.xlane.f32.xlu1 %v35_v13 }
 0x125   :  { %v34_v14 = vpop.xlane.xlu1 %33 }
 0x126   :  { %v38_v15 = vmul.f32 0.03125, %v34_v14 }
 0x128   :  { %v40_v16 = vadd.f32 1e-12, %v38_v15 }
 0x129   :  { %v37_v17 = vpop.xlane.xlu1 %36 }
 0x12a   :  { %70 = vrsqrt.f32 %v40_v16  ;;  %v39_v18 = vmul.f32 0.03125, %v37_v17 }
 0x12c   :  { %v41_v19 = vadd.f32 1e-12, %v39_v18 }
 0x12e   :  { %72 = vrsqrt.f32 %v41_v19 }
 0x134   :  { %v71_v20 = vpop.eup %70 }
 0x135   :  { %v44_v22 = vmul.f32 %v71_v20, %v28_v6 }
 0x137   :  { %v52_v24 = vmul.f32 %v68_v21, %v44_v22 }
 0x138   :  { %v73_v25 = vpop.eup %72 }
 0x139   :  { %v60_v26 = vadd.f32 %v69_v23, %v52_v24  ;;  %v45_v27 = vmul.f32 %v73_v25, %v29_v10 }
 0x13b   :  { %62 = vst.msk [vmem:[%s121_s3] sm:$0xff] %vm18_vm0, %v60_v26  ;;  %v53_v28 = vmul.f32 %v68_v21, %v45_v27 }
 0x13d   :  { %v61_v29 = vadd.f32 %v69_v23, %v53_v28 }
 0x13f   :  { %63 = vst.msk [vmem:[%s121_s3 + $0x8] sm:$0xff] %vm18_vm0, %v61_v29 }

// kernel: bert2bert_forward.11
= control target key start
LH: loop header
LB: loop body
LE: loop exit
PB: predicated region body
PF: predicated region fallthrough
CT: control target
= control target key end

     0   :  { %vm39_vm0 = vcmask 261120   ;;  %vm154_vm1 = vcmask 523264   ;;  %s487_s1 = inlined_call_operand.vmem [shape: f32[32,64], index: 1, kind: input, shape index: {}]   ;;  %s488_s0 = inlined_call_operand.vmem [shape: f32[16,32], index: 0, kind: input, shape index: {}]   ;;  %s489_s3 = inlined_call_operand.vmem [shape: f32[64,32], index: 3, kind: input, shape index: {}]   ;;  %s490_s2 = inlined_call_operand.vmem [shape: f32[1,64], index: 2, kind: input, shape index: {}]   ;;  %s491_s4 = inlined_call_operand.vmem [shape: f32[1,32], index: 4, kind: input, shape index: {}]   ;;  %s492_s5 = inlined_call_operand.vmem [shape: f32[1,32], index: 5, kind: input, shape index: {}]   ;;  %s493_s6 = inlined_call_operand.vmem [shape: f32[1,32], index: 6, kind: input, shape index: {}]   ;;  %s494_s7 = inlined_call_operand.vmem [shape: f32[16,32], index: 7, kind: output, shape index: {}]  }
   0x1   :  { %v28_v0 = vld [vmem:[%s487_s1] sm:$0xff]  ;;  %v29_v1 = vld [vmem:[%s487_s1 + $0x8] sm:$0xff]  ;;  %v30_v2 = vld [vmem:[%s487_s1 + $0x10] sm:$0xff] }
   0x2   :  { %v343_v3 = vpack.c.bf16 %v29_v1, %v28_v0  ;;  %v31_v4 = vld [vmem:[%s487_s1 + $0x18] sm:$0xff]  ;;  %v430_v5 = vld [vmem:[%s488_s0] sm:$0xff]  ;;  %v27_v7 = vld [vmem:[%s488_s0 + $0x8] sm:$0xff] }
   0x3   :  { %v347_v6 = vpack.c.bf16 %v31_v4, %v30_v2  ;;  %321 = vmatprep.mubr.msk.f32.mxu0 %vm39_vm0, %v430_v5  ;;  %v139_v8 = vld [vmem:[%s489_s3] sm:$0xff]  ;;  %v140_v9 = vld [vmem:[%s489_s3 + $0x8] sm:$0xff]  ;;  %v141_v10 = vld [vmem:[%s489_s3 + $0x10] sm:$0xff] }
   0x4   :  { %344 = vmatprep.subr.bf16.mxu0 %v343_v3  ;;  %v351_v11 = vpack.c.bf16 %v140_v9, %v139_v8  ;;  %v142_v12 = vld [vmem:[%s489_s3 + $0x18] sm:$0xff]  ;;  %v143_v14 = vld [vmem:[%s489_s3 + $0x20] sm:$0xff]  ;;  %v144_v15 = vld [vmem:[%s489_s3 + $0x28] sm:$0xff] }
   0x5   :  { %346 = vmatpush3.bf16.msra.mxu0 %v343_v3  ;;  %v355_v13 = vpack.c.bf16 %v142_v12, %v141_v10  ;;  %v359_v16 = vpack.c.bf16 %v144_v15, %v143_v14  ;;  %v145_v17 = vld [vmem:[%s489_s3 + $0x30] sm:$0xff]  ;;  %v146_v18 = vld [vmem:[%s489_s3 + $0x38] sm:$0xff]  ;;  %v289_v20 = vld [vmem:[%s490_s2] ss:$0 sm:$0xff] }
   0x6   :  { %348 = vmatprep.subr.bf16.mxu0 %v347_v6  ;;  %352 = vmatprep.subr.bf16.mxu1 %v351_v11  ;;  %v363_v19 = vpack.c.bf16 %v146_v18, %v145_v17  ;;  %v292_v43 = vld [vmem:[%s491_s4] ss:$0 sm:$0xff] }
   0x7   :  { %354 = vmatpush3.bf16.msra.mxu1 %v351_v11 }
   0x8   :  { %356 = vmatprep.subr.bf16.mxu1 %v355_v13 }
   0x9   :  { %350 = vmatpush3.bf16.msra.mxu0 %v347_v6 }
   0xb   :  { %358 = vmatpush3.bf16.msra.mxu1 %v355_v13 }
   0xc   :  { %322 = vmatmul.mubr.msk.f32.vlgmr.msra.gmra.mrb[0].mxu0 %vm39_vm0, %v27_v7  ;;  %360 = vmatprep.subr.bf16.mxu1 %v359_v16 }
   0xf   :  { %362 = vmatpush3.bf16.msra.mxu1 %v359_v16 }
  0x10   :  { %364 = vmatprep.subr.bf16.mxu1 %v363_v19 }
  0x13   :  { %366 = vmatpush3.bf16.msra.mxu1 %v363_v19 }
  0xdf   :  { %v323_v21 = vpop.f32.mrb[0].mxu0 }
  0xe0   :  { %v118_v22 = vadd.f32 %v323_v21, %v289_v20  ;;  %v112_v23 = vpop.f32.mrb[1].mxu0 }
  0xe1   :  { %v113_v24 = vadd.f32 %v289_v20, %v112_v23 }
  0xe2   :  { %v124_v25 = vmul.f32 0.044715, %v118_v22  ;;  %v122_v40 = vmul.f32 0.5, %v118_v22 }
  0xe3   :  { %v123_v26 = vmul.f32 0.044715, %v113_v24  ;;  %v121_v38 = vmul.f32 0.5, %v113_v24 }
  0xe4   :  { %v126_v27 = vmul.f32 %v124_v25, %v118_v22 }
  0xe5   :  { %v125_v28 = vmul.f32 %v123_v26, %v113_v24 }
  0xe6   :  { %v128_v29 = vmul.f32 %v126_v27, %v118_v22 }
  0xe7   :  { %v127_v30 = vmul.f32 %v125_v28, %v113_v24 }
  0xe8   :  { %v130_v31 = vadd.f32 %v128_v29, %v118_v22 }
  0xe9   :  { %v129_v32 = vadd.f32 %v127_v30, %v113_v24 }
  0xea   :  { %v132_v33 = vmul.f32 0.7978846, %v130_v31 }
  0xeb   :  { %v131_v34 = vmul.f32 0.7978846, %v129_v32 }
  0xec   :  { %367 = vtanh.f32 %v132_v33 }
  0xed   :  { %369 = vtanh.f32 %v131_v34 }
  0xf6   :  { %v368_v35 = vpop.eup %367 }
  0xf7   :  { %v370_v36 = vpop.eup %369  ;;  %v136_v37 = vadd.f32 1.0, %v368_v35 }
  0xf8   :  { %v135_v39 = vadd.f32 1.0, %v370_v36 }
  0xf9   :  { %v138_v42 = vmul.f32 %v136_v37, %v122_v40 }
  0xfa   :  { %v137_v41 = vmul.f32 %v135_v39, %v121_v38 }
  0xfc   :  { %340 = vmatprep.mubr.msk.f32.mxu1 %vm154_vm1, %v137_v41 }
  0xfd   :  { %341 = vmatmul.mubr.msk.f32.vlgmr.msra.gmra.mrb[0].mxu1 %vm154_vm1, %v138_v42 }
 0x1d0   :  { %v342_v44 = vpop.f32.mrb[0].mxu1 }
 0x1d1   :  { %v227_v45 = vpop.f32.mrb[1].mxu1  ;;  %v233_v46 = vadd.f32 %v342_v44, %v292_v43 }
 0x1d2   :  { %v228_v47 = vadd.f32 %v292_v43, %v227_v45 }
 0x1d3   :  { %v237_v50 = vadd.f32 %v233_v46, %v27_v7  ;;  %v296_v7 = vld [vmem:[%s493_s6] ss:$0 sm:$0xff] }
 0x1d4   :  { %v236_v48 = vadd.f32 %v228_v47, %v430_v5  ;;  %v295_v5 = vld [vmem:[%s492_s5] ss:$0 sm:$0xff] }
 0x1d5   :  { %v243_v51 = vsel %vm39_vm0, %v237_v50, 0.0 }
 0x1d6   :  { %v240_v49 = vsel %vm39_vm0, %v236_v48, 0.0 }
 0x1d7   :  { %241 = vadd.xlane.f32.xlu0 %v240_v49 }
 0x1db   :  { %244 = vadd.xlane.f32.xlu0 %v243_v51 }
 0x264   :  { %v242_v52 = vpop.xlane.xlu0 %241 }
 0x265   :  { %v247_v53 = vmul.f32 0.03125, %v242_v52 }
 0x267   :  { %v249_v54 = vsub.f32 %v236_v48, %v247_v53 }
 0x268   :  { %v245_v55 = vpop.xlane.xlu0 %244 }
 0x269   :  { %v248_v56 = vmul.f32 0.03125, %v245_v55  ;;  %v251_v57 = vmul.f32 %v249_v54, %v249_v54 }
 0x26b   :  { %v250_v58 = vsub.f32 %v237_v50, %v248_v56  ;;  %v253_v59 = vsel %vm39_vm0, %v251_v57, 0.0 }
 0x26c   :  { %254 = vadd.xlane.f32.xlu1 %v253_v59 }
 0x26d   :  { %v252_v60 = vmul.f32 %v250_v58, %v250_v58 }
 0x26f   :  { %v256_v61 = vsel %vm39_vm0, %v252_v60, 0.0 }
 0x270   :  { %257 = vadd.xlane.f32.xlu1 %v256_v61 }
 0x2f9   :  { %v255_v62 = vpop.xlane.xlu1 %254 }
 0x2fa   :  { %v259_v63 = vmul.f32 0.03125, %v255_v62 }
 0x2fc   :  { %v261_v0 = vadd.f32 1e-12, %v259_v63 }
 0x2fd   :  { %v258_v1 = vpop.xlane.xlu1 %257 }
 0x2fe   :  { %371 = vrsqrt.f32 %v261_v0  ;;  %v260_v2 = vmul.f32 0.03125, %v258_v1 }
 0x300   :  { %v262_v3 = vadd.f32 1e-12, %v260_v2 }
 0x302   :  { %373 = vrsqrt.f32 %v262_v3 }
 0x308   :  { %v372_v4 = vpop.eup %371 }
 0x309   :  { %v265_v6 = vmul.f32 %v372_v4, %v249_v54 }
 0x30b   :  { %v273_v8 = vmul.f32 %v295_v5, %v265_v6 }
 0x30c   :  { %v374_v9 = vpop.eup %373 }
 0x30d   :  { %v281_v10 = vadd.f32 %v296_v7, %v273_v8  ;;  %v266_v11 = vmul.f32 %v374_v9, %v250_v58 }
 0x30f   :  { %283 = vst.msk [vmem:[%s494_s7] sm:$0xff] %vm39_vm0, %v281_v10  ;;  %v274_v12 = vmul.f32 %v295_v5, %v266_v11 }
 0x311   :  { %v282_v13 = vadd.f32 %v296_v7, %v274_v12 }
 0x313   :  { %284 = vst.msk [vmem:[%s494_s7 + $0x8] sm:$0xff] %vm39_vm0, %v282_v13 }

// kernel: bert2bert_forward.10
= control target key start
LH: loop header
LB: loop body
LE: loop exit
PB: predicated region body
PF: predicated region fallthrough
CT: control target
= control target key end

     0   :  { %s1512_s27 = smov 0   ;;  %s1652_s0 = inlined_call_operand.vmem [shape: f32[2,8,32], index: 0, kind: input, shape index: {}]   ;;  %s1653_s1 = inlined_call_operand.vmem [shape: f32[2,8,8], index: 1, kind: input, shape index: {}]   ;;  %s1654_s2 = inlined_call_operand.vmem [shape: f32[32,96], index: 2, kind: input, shape index: {}]   ;;  %s1655_s3 = inlined_call_operand.vmem [shape: f32[1,96], index: 3, kind: input, shape index: {}]   ;;  %s1656_s4 = inlined_call_operand.vmem [shape: f32[32,32], index: 4, kind: input, shape index: {}]   ;;  %s1657_s5 = inlined_call_operand.vmem [shape: f32[1,32], index: 5, kind: input, shape index: {}]   ;;  %s1658_s6 = inlined_call_operand.vmem [shape: f32[1,32], index: 6, kind: input, shape index: {}]   ;;  %s1659_s7 = inlined_call_operand.vmem [shape: f32[1,32], index: 7, kind: input, shape index: {}]   ;;  %s1660_s8 = inlined_call_operand.vmem [shape: f32[2,8,32], index: 8, kind: output, shape index: {}]  }
   0x1 LB: > { %s1271_s28 = sadd.s32 4294967295, %s1448_s27   ;;  %p1275_p0 = scmp.ge.s32.totalorder %s1448_s27, 1  ;;  %s1448_s27 = sphi %s1512_s27, %s18_s27  }
   0x2   : > { %p270_p1 = scmp.lt.s32.totalorder %s1448_s27, 3 }
   0x4   : > { %p271_p2 = pnand %p1275_p0, %p270_p1 }
   0x5   : > { %v319_v0 = vld [vmem:[%s1654_s2] sm:$0xff] (!%p271_p2)  ;;  %v320_v1 = vld [vmem:[%s1654_s2 + $0x8] sm:$0xff] (!%p271_p2)  ;;  %v321_v2 = vld [vmem:[%s1654_s2 + $0x10] sm:$0xff] (!%p271_p2)  ;;  %v1450_v3 = vmov (!%p271_p2), 0.0|0.0   ;;  %vm1451_vm0 = vmmov (!%p271_p2), 0   ;;  %v1452_v6 = vmov (!%p271_p2), 0.0  }
   0x6   : > { %274 = sbr.rel (%p271_p2) target bundleno = 2319 (0x90f), region = 52  ;;  %1387 = vmatprep.subr.bf16.mxu0 (!%p271_p2), %v1450_v3  ;;  %v1388_v4 = vpack.c.bf16 (!%p271_p2), %v320_v1, %v319_v0  ;;  %v322_v5 = vld [vmem:[%s1654_s2 + $0x18] sm:$0xff] (!%p271_p2)  ;;  %1333 = vmatprep.mubr.msk.f32.mxu0 (!%p271_p2), %vm1451_vm0, %v1452_v6  ;;  %p306_p3 = scmp.lt.s32.totalorder (!%p271_p2), %s1271_s28, 1  ;;  %vm330_vm1 = vcmask (!%p271_p2), 261120   ;;  %v1279_v9 = vld [vmem:[%s1655_s3] ss:$0 sm:$0xff] (!%p271_p2) }
   0x7   : > { %1336 = vmatprep.subr.mxu1 (!%p271_p2), %v1452_v6  ;;  %1338 = vmatprep.mubr.msk.f32.mxu1 (!%p271_p2), %vm1451_vm0, %v1452_v6  ;;  %v1391_v7 = vpack.c.bf16 (!%p271_p2), %v322_v5, %v321_v2  ;;  %s1453_s21 = smov (!%p271_p2), 64   ;;  %s1454_s22 = smov (!%p271_p2), 96   ;;  %vm408_vm2 = vcmask (!%p271_p2), 64512   ;;  %vm1086_vm3 = vcmask (!%p271_p2), 130048   ;;  %vm1088_vm4 = vcmask (!%p271_p2), 195584  }
   0x8   : > { %1389 = vmatpush3.bf16.msra.mxu0 (!%p271_p2), %v1388_v4  ;;  %s1455_s23 = smov (!%p271_p2), 88   ;;  %s1456_s24 = smov (!%p271_p2), 120  }
   0x9   : > { %1390 = vmatprep.subr.bf16.mxu0 (!%p271_p2), %v1450_v3  ;;  %s1457_s25 = smov (!%p271_p2), 80   ;;  %s1458_s30 = smov (!%p271_p2), 72  }
   0xa   : > { %s1459_s9 = smov (!%p271_p2), 112   ;;  %s1460_s10 = smov (!%p271_p2), 104  }
   0xb   : > { %s1461_s11 = smov (!%p271_p2), 56   ;;  %s1462_s12 = smov (!%p271_p2), 48  }
   0xc   : > { %1392 = vmatpush3.bf16.msra.mxu0 (!%p271_p2), %v1391_v7  ;;  %s1463_s13 = smov (!%p271_p2), 40  }
   0xd   : > { %s1662_s28 = smov (!%p306_p3, %s1271_s28), 1  ;;  %1356 = vmatprep.subr.mxu0 %v1452_v6 }
   0xe   : > { %s1539_s15 = sshll.u32 %s1662_s28, 3 }
   0xf   : > { %s309_s18 = scalar_lea.vmem %s1652_s0, %s1539_s15  ;;  %s313_s29 = scalar_lea.vmem %s1653_s1, %s1539_s15 }
  0x10   : > { %v1545_v8 = vld [vmem:[%s309_s18] sm:$0xff] }
  0x11   : > { %1334 = vmatmul.mubr.msk.f32.vlgmr.msra.gmra.mrb[0].mxu0 %vm330_vm1, %v1545_v8  ;;  %v404_v19 = vld [vmem:[%s313_s29] sm:$0xff] }
  0x12   : > { %1358 = vmatprep.mubr.msk.f32.mxu0 %vm1451_vm0, %v1452_v6 }
  0xe4   : > { %v400_v10 = vpop.f32.mrb[0].mxu0 }
  0xe5   : > { %v1555_v11 = vadd.f32 %v1279_v9, %v400_v10  ;;  %v1335_v12 = vpop.f32.mrb[1].mxu0 }
  0xe7   : > { %496 = vrot.lane.b32.xlu1 %v1555_v11, %s1453_s21  ;;  %406 = vrot.lane.b32.xlu0 %v1555_v11, %s1454_s22 }
  0xeb   : > { %574 = vrot.lane.b32.xlu1 %v1555_v11, %s1455_s23  ;;  %s1464_s23 = smov 8  }
  0xef   : > { %572 = vrot.lane.b32.xlu1 %v1555_v11, %s1456_s24  ;;  %s1465_s24 = smov 16  }
  0xf3   : > { %741 = vrot.lane.b32.xlu1 %v1555_v11, %s1457_s25  ;;  %s1466_s25 = smov 24  }
 0x159   : > { %v497_v13 = vpop.permute.xlu1 %496  ;;  %v407_v14 = vpop.permute.xlu0 %406 }
 0x15a   : > { %1337 = vmatpush3.xpose.msk.msra.mxu1 %vm408_vm2, %v407_v14 }
 0x15b   : > { %1341 = vmatprep.subr.mxu1 %v1452_v6 }
 0x15d   : > { %v575_v15 = vpop.permute.xlu1 %574  ;;  %1339 = vmatmul.mubr.msk.f32.vlgmr.msra.gmra.mrb[0].mxu1 %vm408_vm2, %v1555_v11 }
 0x15e   : > { %1342 = vmatpush3.msra.mxu1 %v497_v13  ;;  %1343 = vmatprep.mubr.msk.f32.mxu1 %vm1451_vm0, %v1452_v6 }
 0x15f   : > { %1346 = vmatprep.subr.mxu1 %v1452_v6 }
 0x161   : > { %v573_v16 = vpop.permute.xlu1 %572 }
 0x165   : > { %v742_v17 = vpop.permute.xlu1 %741 }
 0x166   : > { %1357 = vmatpush3.xpose.msk.msra.mxu0 %vm408_vm2, %v742_v17 }
 0x167   : > { %1366 = vmatprep.subr.mxu0 %v1452_v6 }
 0x230   : > { %v479_v18 = vpop.f32.mrb[0].mxu1 }
 0x231   : > { %v483_v20 = vmul.f32 0.35355338, %v479_v18  ;;  %v1340_v21 = vpop.f32.mrb[1].mxu1  ;;  %v1090_v18 = vld [vmem:[%s1656_s4] sm:$0xff] }
 0x232   : > { %v1092_v21 = vld [vmem:[%s1656_s4 + $0x10] sm:$0xff] }
 0x233   : > { %v484_v22 = vadd.f32 %v483_v20, %v404_v19 }
 0x235   : > { %v485_v23 = vsel %vm408_vm2, %v484_v22, -inf }
 0x236   : > { %486 = vmax.xlane.f32.xlu0 %v485_v23 }
 0x24c   : > { %908 = vrot.lane.b32.xlu0 %v1555_v11, %s1458_s30 }
 0x2c3   : > { %v487_v24 = vpop.xlane.xlu0 %486 }
 0x2c4   : > { %v488_v25 = vsub.f32 %v484_v22, %v487_v24 }
 0x2c6   : > { %v489_v26 = vmul.f32 1.442695, %v488_v25 }
 0x2c7   : > { %v909_v31 = vpop.permute.xlu0 %908 }
 0x2c8   : > { %1424 = vpow2.f32 %v489_v26 }
 0x2d2   : > { %v1425_v27 = vpop.eup %1424 }
 0x2d3   : > { %v491_v28 = vsel %vm408_vm2, %v1425_v27, 0.0 }
 0x2d4   : > { %492 = vadd.xlane.f32.xlu1 %v491_v28 }
 0x2e5   : > { %739 = vrot.lane.b32.xlu1 %v1555_v11, %s1459_s9 }
 0x2e9   : > { %906 = vrot.lane.b32.xlu1 %v1555_v11, %s1460_s10 }
 0x361   : > { %v493_v29 = vpop.xlane.xlu1 %492 }
 0x362   : > { %1426 = vrcp.f32 %v493_v29 }
 0x365   : > { %v740_v30 = vpop.permute.xlu1 %739 }
 0x366   : > { %1359 = vmatmul.mubr.msk.f32.vlgmr.msra.gmra.mrb[2].mxu0 %vm408_vm2, %v740_v30 }
 0x367   : > { %1367 = vmatpush3.xpose.msk.msra.mxu0 %vm408_vm2, %v909_v31  ;;  %1368 = vmatprep.mubr.msk.f32.mxu0 %vm1451_vm0, %v1452_v6 }
 0x368   : > { %1393 = vmatprep.subr.bf16.mxu0 %v1450_v3 }
 0x369   : > { %v907_v32 = vpop.permute.xlu1 %906 }
 0x36a   : > { %1369 = vmatmul.mubr.msk.f32.vlgmr.msra.gmra.mrb[4].mxu0 %vm408_vm2, %v907_v32 }
 0x36b   : > { %1384 = vmatprep.mubr.msk.f32.mxu0 %vm1451_vm0, %v1452_v6 }
 0x36c   : > { %v1427_v33 = vpop.eup %1426 }
 0x36d   : > { %v495_v34 = vmul.f32 %v1427_v33, %v1425_v27 }
 0x36f   : > { %1344 = vmatmul.mubr.msk.f32.vlgmr.msra.gmra.mrb[2].mxu1 %vm408_vm2, %v495_v34  ;;  %v1293_v34 = vld [vmem:[%s1657_s5] ss:$0 sm:$0xff] }
 0x370   : > { %1347 = vmatpush3.xpose.msk.msra.mxu1 %vm408_vm2, %v575_v15  ;;  %1348 = vmatprep.mubr.msk.f32.mxu1 %vm1451_vm0, %v1452_v6 }
 0x371   : > { %1351 = vmatprep.subr.mxu1 %v1452_v6 }
 0x373   : > { %1349 = vmatmul.mubr.msk.f32.vlgmr.msra.gmra.mrb[4].mxu1 %vm408_vm2, %v573_v16 }
 0x374   : > { %1353 = vmatprep.mubr.msk.f32.mxu1 %vm1451_vm0, %v1452_v6 }
 0x439   : > { %v813_v35 = vpop.f32.mrb[2].mxu0 }
 0x43a   : > { %v817_v36 = vmul.f32 0.35355338, %v813_v35  ;;  %v1360_v37 = vpop.f32.mrb[3].mxu0 }
 0x43c   : > { %v818_v38 = vadd.f32 %v817_v36, %v404_v19 }
 0x43d   : > { %v980_v39 = vpop.f32.mrb[4].mxu0 }
 0x43e   : > { %v1370_v40 = vpop.f32.mrb[5].mxu0  ;;  %v819_v41 = vsel %vm408_vm2, %v818_v38, -inf  ;;  %v984_v45 = vmul.f32 0.35355338, %v980_v39 }
 0x43f   : > { %820 = vmax.xlane.f32.xlu0 %v819_v41 }
 0x440   : > { %v985_v50 = vadd.f32 %v984_v45, %v404_v19 }
 0x442   : > { %v1597_v42 = vpop.f32.mrb[2].mxu1  ;;  %v986_v51 = vsel %vm408_vm2, %v985_v50, -inf }
 0x443   : > { %v1345_v43 = vpop.f32.mrb[3].mxu1 }
 0x446   : > { %v646_v44 = vpop.f32.mrb[4].mxu1 }
 0x447   : > { %v650_v46 = vmul.f32 0.35355338, %v646_v44  ;;  %v1350_v47 = vpop.f32.mrb[5].mxu1 }
 0x449   : > { %v651_v48 = vadd.f32 %v650_v46, %v404_v19  ;;  %v1091_v19 = vld [vmem:[%s1656_s4 + $0x8] sm:$0xff] }
 0x44a   : > { %v1394_v20 = vpack.c.bf16 %v1091_v19, %v1090_v18 }
 0x44b   : > { %v652_v49 = vsel %vm408_vm2, %v651_v48, -inf }
 0x44c   : > { %653 = vmax.xlane.f32.xlu1 %v652_v49  ;;  %1395 = vmatpush3.bf16.msra.mxu0 %v1394_v20 }
 0x44d   : > { %1396 = vmatprep.subr.bf16.mxu0 %v1450_v3 }
 0x450   : > { %987 = vmax.xlane.f32.xlu1 %v986_v51 }
 0x4cc   : > { %v821_v52 = vpop.xlane.xlu0 %820 }
 0x4cd   : > { %v822_v53 = vsub.f32 %v818_v38, %v821_v52 }
 0x4cf   : > { %v823_v54 = vmul.f32 1.442695, %v822_v53 }
 0x4d1   : > { %1428 = vpow2.f32 %v823_v54 }
 0x4d9   : > { %v654_v55 = vpop.xlane.xlu1 %653 }
 0x4da   : > { %v655_v63 = vsub.f32 %v651_v48, %v654_v55 }
 0x4db   : > { %v1429_v56 = vpop.eup %1428 }
 0x4dc   : > { %v825_v57 = vsel %vm408_vm2, %v1429_v56, 0.0  ;;  %v656_v0 = vmul.f32 1.442695, %v655_v63 }
 0x4dd   : > { %826 = vadd.xlane.f32.xlu1 %v825_v57  ;;  %v988_v58 = vpop.xlane.xlu1 %987 }
 0x4de   : > { %v989_v59 = vsub.f32 %v985_v50, %v988_v58  ;;  %v1296_v50 = vld [vmem:[%s1659_s7] ss:$0 sm:$0xff] }
 0x4e0   : > { %v990_v60 = vmul.f32 1.442695, %v989_v59 }
 0x4e2   : > { %1430 = vpow2.f32 %v990_v60 }
 0x4e3   : > { %1432 = vpow2.f32 %v656_v0 }
 0x4ec   : > { %v1431_v61 = vpop.eup %1430 }
 0x4ed   : > { %v992_v62 = vsel %vm408_vm2, %v1431_v61, 0.0  ;;  %v1433_v1 = vpop.eup %1432 }
 0x4ee   : > { %663 = vrot.lane.b32.xlu1 %v1555_v11, %s1461_s11  ;;  %993 = vadd.xlane.f32.xlu0 %v992_v62  ;;  %v658_v2 = vsel %vm408_vm2, %v1433_v1, 0.0 }
 0x504   : > { %830 = vrot.lane.b32.xlu0 %v1555_v11, %s1462_s12 }
 0x512   : > { %659 = vadd.xlane.f32.xlu1 %v658_v2 }
 0x523   : > { %997 = vrot.lane.b32.xlu1 %v1555_v11, %s1463_s13  ;;  %s317_s13 = scalar_lea.vmem %s1660_s8, %s1539_s15 }
 0x56a   : > { %v827_v4 = vpop.xlane.xlu1 %826 }
 0x56e   : > { %v664_v5 = vpop.permute.xlu1 %663 }
 0x56f   : > { %1352 = vmatpush3.msra.mxu1 %v664_v5 }
 0x570   : > { %1361 = vmatprep.subr.mxu1 %v1452_v6 }
 0x57b   : > { %v994_v9 = vpop.xlane.xlu0 %993 }
 0x57f   : > { %v831_v14 = vpop.permute.xlu0 %830 }
 0x59f   : > { %v660_v7 = vpop.xlane.xlu1 %659 }
 0x5a0   : > { %1434 = vrcp.f32 %v660_v7 }
 0x5a1   : > { %1436 = vrcp.f32 %v827_v4 }
 0x5a2   : > { %1438 = vrcp.f32 %v994_v9 }
 0x5a3   : > { %v998_v16 = vpop.permute.xlu1 %997 }
 0x5aa   : > { %v1435_v10 = vpop.eup %1434 }
 0x5ab   : > { %v662_v12 = vmul.f32 %v1435_v10, %v1433_v1  ;;  %v1437_v13 = vpop.eup %1436 }
 0x5ac   : > { %v829_v11 = vmul.f32 %v1437_v13, %v1429_v56  ;;  %v1439_v15 = vpop.eup %1438 }
 0x5ad   : > { %1354 = vmatmul.mubr.msk.f32.vlgmr.msra.gmra.mrb[6].mxu1 %vm408_vm2, %v662_v12  ;;  %v996_v17 = vmul.f32 %v1439_v15, %v1431_v61 }
 0x5ae   : > { %1362 = vmatpush3.msra.mxu1 %v831_v14  ;;  %1363 = vmatprep.mubr.msk.f32.mxu1 %vm1451_vm0, %v1452_v6 }
 0x5af   : > { %1371 = vmatprep.subr.mxu1 %v1452_v6 }
 0x5b1   : > { %1364 = vmatmul.mubr.msk.f32.vlgmr.msra.gmra.mrb[8].mxu1 %vm408_vm2, %v829_v11 }
 0x5b2   : > { %1372 = vmatpush3.msra.mxu1 %v998_v16  ;;  %1373 = vmatprep.mubr.msk.f32.mxu1 %vm1451_vm0, %v1452_v6  ;;  %v1093_v6 = vld [vmem:[%s1656_s4 + $0x18] sm:$0xff] }
 0x5b3   : > { %v1397_v22 = vpack.c.bf16 %v1093_v6, %v1092_v21 }
 0x5b5   : > { %1374 = vmatmul.mubr.msk.f32.vlgmr.msra.gmra.mrb[10].mxu1 %vm408_vm2, %v996_v17  ;;  %1398 = vmatpush3.bf16.msra.mxu0 %v1397_v22 }
 0x680   : > { %v735_v23 = vpop.f32.mrb[6].mxu1 }
 0x681   : > { %1074 = vrot.lane.b32.xlu1 %v735_v23, %s1464_s23  ;;  %v1355_v24 = vpop.f32.mrb[7].mxu1 }
 0x684   : > { %v902_v25 = vpop.f32.mrb[8].mxu1 }
 0x685   : > { %1078 = vrot.lane.b32.xlu0 %v902_v25, %s1465_s24  ;;  %v1365_v26 = vpop.f32.mrb[9].mxu1 }
 0x688   : > { %v1069_v27 = vpop.f32.mrb[10].mxu1 }
 0x689   : > { %1082 = vrot.lane.b32.xlu1 %v1069_v27, %s1466_s25  ;;  %v1375_v3 = vpop.f32.mrb[11].mxu1 }
 0x6f3   : > { %v1075_v28 = vpop.permute.xlu1 %1074 }
 0x6f4   : > { %v1085_v30 = vsel %vm408_vm2, %v1597_v42, %v1075_v28 }
 0x6f7   : > { %v1079_v29 = vpop.permute.xlu0 %1078 }
 0x6f8   : > { %v1087_v31 = vsel %vm1086_vm3, %v1085_v30, %v1079_v29 }
 0x6fb   : > { %v1083_v32 = vpop.permute.xlu1 %1082 }
 0x6fc   : > { %v1089_v33 = vsel %vm1088_vm4, %v1087_v31, %v1083_v32 }
 0x6fd   : > { %1385 = vmatmul.mubr.msk.f32.vlgmr.msra.gmra.mrb[6].mxu0 %vm330_vm1, %v1089_v33 }
 0x7d0   : > { %v1170_v35 = vpop.f32.mrb[6].mxu0 }
 0x7d1   : > { %v1171_v36 = vadd.f32 %v1293_v34, %v1170_v35  ;;  %v1386_v37 = vpop.f32.mrb[7].mxu0 }
 0x7d3   : > { %v1174_v38 = vadd.f32 %v1171_v36, %v1545_v8  ;;  %v1295_v8 = vld [vmem:[%s1658_s6] ss:$0 sm:$0xff] }
 0x7d5   : > { %v1177_v39 = vsel %vm330_vm1, %v1174_v38, 0.0 }
 0x7d6   : > { %1178 = vadd.xlane.f32.xlu0 %v1177_v39 }
 0x863   : > { %v1179_v40 = vpop.xlane.xlu0 %1178 }
 0x864   : > { %v1181_v41 = vmul.f32 0.03125, %v1179_v40 }
 0x866   : > { %v1182_v42 = vsub.f32 %v1174_v38, %v1181_v41 }
 0x868   : > { %v1183_v43 = vmul.f32 %v1182_v42, %v1182_v42 }
 0x86a   : > { %v1184_v44 = vsel %vm330_vm1, %v1183_v43, 0.0 }
 0x86b   : > { %1185 = vadd.xlane.f32.xlu1 %v1184_v44 }
 0x8f8   : > { %v1186_v45 = vpop.xlane.xlu1 %1185 }
 0x8f9   : > { %v1187_v46 = vmul.f32 0.03125, %v1186_v45 }
 0x8fb   : > { %v1188_v47 = vadd.f32 1e-12, %v1187_v46 }
 0x8fd   : > { %1440 = vrsqrt.f32 %v1188_v47 }
 0x907   : > { %v1441_v48 = vpop.eup %1440 }
 0x908   : > { %v1190_v49 = vmul.f32 %v1441_v48, %v1182_v42 }
 0x90a   : > { %v1197_v51 = vmul.f32 %v1295_v8, %v1190_v49 }
 0x90c   : > { %v1204_v52 = vadd.f32 %v1296_v50, %v1197_v51 }
 0x90e   : > { %1205 = vst.msk [vmem:[%s317_s13] sm:$0xff] %vm330_vm1, %v1204_v52 }
 0x90f PF: > { %s18_s27 = sadd.s32 1, %s1448_s27  }
 0x910   : > { %p15_p4 = scmp.ge.s32.totalorder %s18_s27, 4  }
 0x912   :  { %17 = sbr.rel (!%p15_p4) target bundleno = 1 (0x1), region = 85 }

// kernel: bert2bert_forward.16
= control target key start
LH: loop header
LB: loop body
LE: loop exit
PB: predicated region body
PF: predicated region fallthrough
CT: control target
= control target key end

     0   :  { %vm39_vm0 = vcmask 261120   ;;  %vm276_vm1 = vcmask 523264   ;;  %s445_s1 = inlined_call_operand.vmem [shape: f32[32,32], index: 1, kind: input, shape index: {}]   ;;  %s446_s0 = inlined_call_operand.vmem [shape: f32[16,32], index: 0, kind: input, shape index: {}]   ;;  %s447_s2 = inlined_call_operand.vmem [shape: f32[1,32], index: 2, kind: input, shape index: {}]   ;;  %s448_s5 = inlined_call_operand.vmem [shape: f32[32,64], index: 5, kind: input, shape index: {}]   ;;  %s449_s3 = inlined_call_operand.vmem [shape: f32[1,32], index: 3, kind: input, shape index: {}]   ;;  %s450_s4 = inlined_call_operand.vmem [shape: f32[1,32], index: 4, kind: input, shape index: {}]   ;;  %s451_s6 = inlined_call_operand.vmem [shape: f32[1,64], index: 6, kind: input, shape index: {}]   ;;  %s452_s7 = inlined_call_operand.vmem [shape: f32[16,64], index: 7, kind: output, shape index: {}]  }
   0x1   :  { %v28_v0 = vld [vmem:[%s445_s1] sm:$0xff]  ;;  %v29_v1 = vld [vmem:[%s445_s1 + $0x8] sm:$0xff]  ;;  %v30_v2 = vld [vmem:[%s445_s1 + $0x10] sm:$0xff] }
   0x2   :  { %v325_v3 = vpack.c.bf16 %v29_v1, %v28_v0  ;;  %v31_v4 = vld [vmem:[%s445_s1 + $0x18] sm:$0xff]  ;;  %v26_v5 = vld [vmem:[%s446_s0] sm:$0xff]  ;;  %v27_v7 = vld [vmem:[%s446_s0 + $0x8] sm:$0xff] }
   0x3   :  { %v329_v6 = vpack.c.bf16 %v31_v4, %v30_v2  ;;  %311 = vmatprep.mubr.msk.f32.mxu0 %vm39_vm0, %v26_v5  ;;  %v283_v8 = vld [vmem:[%s447_s2] ss:$0 sm:$0xff]  ;;  %v185_v44 = vld [vmem:[%s448_s5 + $0x8] sm:$0xff]  ;;  %v186_v45 = vld [vmem:[%s448_s5 + $0x10] sm:$0xff] }
   0x4   :  { %326 = vmatprep.subr.bf16.mxu0 %v325_v3  ;;  %v184_v43 = vld [vmem:[%s448_s5] sm:$0xff]  ;;  %v187_v47 = vld [vmem:[%s448_s5 + $0x18] sm:$0xff] }
   0x5   :  { %328 = vmatpush3.bf16.msra.mxu0 %v325_v3  ;;  %v333_v46 = vpack.c.bf16 %v185_v44, %v184_v43  ;;  %v337_v48 = vpack.c.bf16 %v187_v47, %v186_v45  ;;  %v286_v56 = vld [vmem:[%s449_s3] ss:$0 sm:$0xff] }
   0x6   :  { %330 = vmatprep.subr.bf16.mxu0 %v329_v6  ;;  %v287_v58 = vld [vmem:[%s450_s4] ss:$0 sm:$0xff] }
   0x7   :  { %334 = vmatprep.subr.bf16.mxu1 %v333_v46  ;;  %v288_v1 = vld [vmem:[%s451_s6] ss:$0 sm:$0xff] }
   0x8   :  { %336 = vmatpush3.bf16.msra.mxu1 %v333_v46 }
   0x9   :  { %332 = vmatpush3.bf16.msra.mxu0 %v329_v6  ;;  %338 = vmatprep.subr.bf16.mxu1 %v337_v48 }
   0xc   :  { %312 = vmatmul.mubr.msk.f32.vlgmr.msra.gmra.mrb[0].mxu0 %vm39_vm0, %v27_v7  ;;  %340 = vmatpush3.bf16.msra.mxu1 %v337_v48 }
  0xdf   :  { %v313_v9 = vpop.f32.mrb[0].mxu0 }
  0xe0   :  { %v118_v10 = vadd.f32 %v313_v9, %v283_v8  ;;  %v112_v11 = vpop.f32.mrb[1].mxu0 }
  0xe1   :  { %v113_v12 = vadd.f32 %v283_v8, %v112_v11 }
  0xe2   :  { %v124_v13 = vmul.f32 0.044715, %v118_v10  ;;  %v122_v29 = vmul.f32 0.5, %v118_v10 }
  0xe3   :  { %v123_v14 = vmul.f32 0.044715, %v113_v12  ;;  %v121_v25 = vmul.f32 0.5, %v113_v12 }
  0xe4   :  { %v126_v15 = vmul.f32 %v124_v13, %v118_v10 }
  0xe5   :  { %v125_v16 = vmul.f32 %v123_v14, %v113_v12 }
  0xe6   :  { %v128_v17 = vmul.f32 %v126_v15, %v118_v10 }
  0xe7   :  { %v127_v18 = vmul.f32 %v125_v16, %v113_v12 }
  0xe8   :  { %v130_v19 = vadd.f32 %v128_v17, %v118_v10 }
  0xe9   :  { %v129_v20 = vadd.f32 %v127_v18, %v113_v12 }
  0xea   :  { %v132_v21 = vmul.f32 0.7978846, %v130_v19 }
  0xeb   :  { %v131_v22 = vmul.f32 0.7978846, %v129_v20 }
  0xec   :  { %341 = vtanh.f32 %v132_v21 }
  0xed   :  { %343 = vtanh.f32 %v131_v22 }
  0xf6   :  { %v342_v23 = vpop.eup %341 }
  0xf7   :  { %v344_v24 = vpop.eup %343  ;;  %v136_v27 = vadd.f32 1.0, %v342_v23 }
  0xf8   :  { %v135_v26 = vadd.f32 1.0, %v344_v24 }
  0xf9   :  { %v138_v31 = vmul.f32 %v136_v27, %v122_v29 }
  0xfa   :  { %v137_v28 = vmul.f32 %v135_v26, %v121_v25 }
  0xfb   :  { %v144_v32 = vsel %vm39_vm0, %v138_v31, 0.0 }
  0xfc   :  { %v141_v30 = vsel %vm39_vm0, %v137_v28, 0.0 }
  0xfd   :  { %142 = vadd.xlane.f32.xlu0 %v141_v30 }
 0x101   :  { %145 = vadd.xlane.f32.xlu0 %v144_v32 }
 0x18a   :  { %v143_v33 = vpop.xlane.xlu0 %142 }
 0x18b   :  { %v148_v34 = vmul.f32 0.03125, %v143_v33 }
 0x18d   :  { %v150_v35 = vsub.f32 %v137_v28, %v148_v34 }
 0x18e   :  { %v146_v36 = vpop.xlane.xlu0 %145 }
 0x18f   :  { %v149_v37 = vmul.f32 0.03125, %v146_v36  ;;  %v152_v38 = vmul.f32 %v150_v35, %v150_v35 }
 0x191   :  { %v151_v39 = vsub.f32 %v138_v31, %v149_v37  ;;  %v154_v40 = vsel %vm39_vm0, %v152_v38, 0.0 }
 0x192   :  { %155 = vadd.xlane.f32.xlu1 %v154_v40 }
 0x193   :  { %v153_v41 = vmul.f32 %v151_v39, %v151_v39 }
 0x195   :  { %v157_v42 = vsel %vm39_vm0, %v153_v41, 0.0 }
 0x196   :  { %158 = vadd.xlane.f32.xlu1 %v157_v42 }
 0x21f   :  { %v156_v49 = vpop.xlane.xlu1 %155 }
 0x220   :  { %v160_v50 = vmul.f32 0.03125, %v156_v49 }
 0x222   :  { %v162_v51 = vadd.f32 1e-12, %v160_v50 }
 0x223   :  { %v159_v52 = vpop.xlane.xlu1 %158 }
 0x224   :  { %345 = vrsqrt.f32 %v162_v51  ;;  %v161_v53 = vmul.f32 0.03125, %v159_v52 }
 0x226   :  { %v163_v54 = vadd.f32 1e-12, %v161_v53 }
 0x228   :  { %347 = vrsqrt.f32 %v163_v54 }
 0x22e   :  { %v346_v55 = vpop.eup %345 }
 0x22f   :  { %v166_v57 = vmul.f32 %v346_v55, %v150_v35 }
 0x231   :  { %v174_v59 = vmul.f32 %v286_v56, %v166_v57 }
 0x232   :  { %v348_v60 = vpop.eup %347 }
 0x233   :  { %v167_v61 = vmul.f32 %v348_v60, %v151_v39  ;;  %v182_v62 = vadd.f32 %v287_v58, %v174_v59 }
 0x235   :  { %v175_v63 = vmul.f32 %v286_v56, %v167_v61  ;;  %322 = vmatprep.mubr.msk.f32.mxu1 %vm39_vm0, %v182_v62 }
 0x237   :  { %v183_v0 = vadd.f32 %v287_v58, %v175_v63 }
 0x239   :  { %323 = vmatmul.mubr.msk.f32.vlgmr.msra.gmra.mrb[0].mxu1 %vm39_vm0, %v183_v0 }
 0x30c   :  { %v324_v2 = vpop.f32.mrb[0].mxu1 }
 0x30d   :  { %v273_v3 = vadd.f32 %v324_v2, %v288_v1  ;;  %v267_v4 = vpop.f32.mrb[1].mxu1 }
 0x30e   :  { %v268_v5 = vadd.f32 %v288_v1, %v267_v4 }
 0x30f   :  { %278 = vst.msk [vmem:[%s452_s7 + $0x8] sm:$0xff] %vm276_vm1, %v273_v3 }
 0x310   :  { %277 = vst.msk [vmem:[%s452_s7] sm:$0xff] %vm276_vm1, %v268_v5 }

// kernel: bert2bert_forward.14
= control target key start
LH: loop header
LB: loop body
LE: loop exit
PB: predicated region body
PF: predicated region fallthrough
CT: control target
= control target key end

     0   :  { %s1738_s17 = smov 0   ;;  %s1895_s0 = inlined_call_operand.vmem [shape: f32[2,8,32], index: 0, kind: input, shape index: {}]   ;;  %s1896_s1 = inlined_call_operand.vmem [shape: f32[2,8,32], index: 1, kind: input, shape index: {}]   ;;  %s1897_s2 = inlined_call_operand.vmem [shape: f32[2,8,8], index: 2, kind: input, shape index: {}]   ;;  %s1898_s3 = inlined_call_operand.vmem [shape: f32[32,32], index: 3, kind: input, shape index: {}]   ;;  %s1899_s4 = inlined_call_operand.vmem [shape: f32[1,32], index: 4, kind: input, shape index: {}]   ;;  %s1900_s5 = inlined_call_operand.vmem [shape: f32[32,64], index: 5, kind: input, shape index: {}]   ;;  %s1901_s6 = inlined_call_operand.vmem [shape: f32[1,64], index: 6, kind: input, shape index: {}]   ;;  %s1902_s7 = inlined_call_operand.vmem [shape: f32[32,32], index: 7, kind: input, shape index: {}]   ;;  %s1903_s8 = inlined_call_operand.vmem [shape: f32[1,32], index: 8, kind: input, shape index: {}]   ;;  %s1904_s9 = inlined_call_operand.vmem [shape: f32[1,32], index: 9, kind: input, shape index: {}]   ;;  %s1905_s10 = inlined_call_operand.vmem [shape: f32[1,32], index: 10, kind: input, shape index: {}]   ;;  %s1906_s11 = inlined_call_operand.vmem [shape: f32[2,8,32], index: 11, kind: output, shape index: {}]  }
   0x1 LB: > { %s1465_s18 = sadd.s32 4294967295, %s1663_s17   ;;  %p1469_p0 = scmp.ge.s32.totalorder %s1663_s17, 1  ;;  %s1663_s17 = sphi %s1738_s17, %s21_s17  }
   0x2   : > { %p354_p1 = scmp.lt.s32.totalorder %s1663_s17, 3 }
   0x4   : > { %p355_p2 = pnand %p1469_p0, %p354_p1 }
   0x5   : > { %v503_v0 = vld [vmem:[%s1900_s5] sm:$0xff] (!%p355_p2)  ;;  %v504_v1 = vld [vmem:[%s1900_s5 + $0x8] sm:$0xff] (!%p355_p2)  ;;  %v1665_v3 = vmov (!%p355_p2), 0.0|0.0   ;;  %v505_v6 = vld [vmem:[%s1900_s5 + $0x10] sm:$0xff] (!%p355_p2)  ;;  %p400_p3 = scmp.lt.s32.totalorder (!%p355_p2), %s1465_s18, 1  ;;  %vm1666_vm0 = vmmov (!%p355_p2), 0  }
   0x6   : > { %358 = sbr.rel (%p355_p2) target bundleno = 1747 (0x6d3), region = 64  ;;  %v418_v2 = vld [vmem:[%s1898_s3] sm:$0xff] (!%p355_p2)  ;;  %1606 = vmatprep.subr.bf16.mxu1 (!%p355_p2), %v1665_v3  ;;  %v1607_v4 = vpack.c.bf16 (!%p355_p2), %v504_v1, %v503_v0  ;;  %1600 = vmatprep.subr.bf16.mxu0 (!%p355_p2), %v1665_v3  ;;  %v419_v5 = vld [vmem:[%s1898_s3 + $0x8] sm:$0xff] (!%p355_p2)  ;;  %v506_v7 = vld [vmem:[%s1900_s5 + $0x18] sm:$0xff] (!%p355_p2)  ;;  %v1667_v9 = vmov (!%p355_p2), 0.0   ;;  %vm429_vm1 = vcmask (!%p355_p2), 261120  }
   0x7   : > { %v1601_v8 = vpack.c.bf16 (!%p355_p2), %v419_v5, %v418_v2  ;;  %1546 = vmatprep.mubr.msk.f32.mxu1 (!%p355_p2), %vm1666_vm0, %v1667_v9  ;;  %v420_v10 = vld [vmem:[%s1898_s3 + $0x10] sm:$0xff] (!%p355_p2)  ;;  %v421_v11 = vld [vmem:[%s1898_s3 + $0x18] sm:$0xff] (!%p355_p2)  ;;  %1535 = vmatprep.mubr.msk.f32.mxu0 (!%p355_p2), %vm1666_vm0, %v1667_v9  ;;  %v1610_v12 = vpack.c.bf16 (!%p355_p2), %v506_v7, %v505_v6  ;;  %v1476_v16 = vld [vmem:[%s1901_s6] ss:$0 sm:$0xff] (!%p355_p2)  ;;  %vm588_vm2 = vcmask (!%p355_p2), 64512   ;;  %s1668_s28 = smov (!%p355_p2), 112  }
   0x8   : > { %1608 = vmatpush3.bf16.msra.mxu1 (!%p355_p2), %v1607_v4  ;;  %v1604_v13 = vpack.c.bf16 (!%p355_p2), %v421_v11, %v420_v10  ;;  %v1474_v18 = vld [vmem:[%s1899_s4] ss:$0 sm:$0xff] (!%p355_p2)  ;;  %s1669_s29 = smov (!%p355_p2), 120   ;;  %s1670_s30 = smov (!%p355_p2), 104   ;;  %vm1268_vm3 = vcmask (!%p355_p2), 130048   ;;  %vm1270_vm4 = vcmask (!%p355_p2), 195584  }
   0x9   : > { %1602 = vmatpush3.bf16.msra.mxu0 (!%p355_p2), %v1601_v8  ;;  %1609 = vmatprep.subr.bf16.mxu1 (!%p355_p2), %v1665_v3  ;;  %s1671_s15 = smov (!%p355_p2), 96   ;;  %s1672_s19 = smov (!%p355_p2), 80  }
   0xa   : > { %1603 = vmatprep.subr.bf16.mxu0 (!%p355_p2), %v1665_v3  ;;  %s1673_s20 = smov (!%p355_p2), 72   ;;  %s1677_s12 = smov (!%p355_p2), 24  }
   0xc   : > { %1611 = vmatpush3.bf16.msra.mxu1 (!%p355_p2), %v1610_v12 }
   0xd   : > { %s1908_s18 = smov (!%p400_p3, %s1465_s18), 1  ;;  %1605 = vmatpush3.bf16.msra.mxu0 %v1604_v13  ;;  %1549 = vmatprep.subr.mxu1 %v1667_v9 }
   0xe   : > { %s1778_s16 = sshll.u32 %s1908_s18, 3  ;;  %1559 = vmatprep.subr.mxu0 %v1667_v9 }
   0xf   : > { %s407_s21 = scalar_lea.vmem %s1896_s1, %s1778_s16  ;;  %s403_s24 = scalar_lea.vmem %s1895_s0, %s1778_s16 }
  0x10   : > { %v417_v14 = vld [vmem:[%s407_s21] sm:$0xff]  ;;  %s411_s14 = scalar_lea.vmem %s1897_s2, %s1778_s16  ;;  %s1674_s21 = smov 88  }
  0x11   : > { %v1788_v15 = vld [vmem:[%s403_s24] sm:$0xff]  ;;  %1547 = vmatmul.mubr.msk.f32.vlgmr.msra.gmra.mrb[0].mxu1 %vm429_vm1, %v417_v14  ;;  %s415_s24 = scalar_lea.vmem %s1906_s11, %s1778_s16 }
  0x12   : > { %1536 = vmatmul.mubr.msk.f32.vlgmr.msra.gmra.mrb[0].mxu0 %vm429_vm1, %v1788_v15  ;;  %1551 = vmatprep.mubr.msk.f32.mxu1 %vm1666_vm0, %v1667_v9  ;;  %v587_v31 = vld [vmem:[%s411_s14] sm:$0xff] }
  0x13   : > { %1561 = vmatprep.mubr.msk.f32.mxu0 %vm1666_vm0, %v1667_v9 }
  0xe4   : > { %v583_v17 = vpop.f32.mrb[0].mxu1 }
  0xe5   : > { %v1805_v19 = vadd.f32 %v1476_v16, %v583_v17  ;;  %v1548_v20 = vpop.f32.mrb[1].mxu1  ;;  %v499_v21 = vpop.f32.mrb[0].mxu0 }
  0xe6   : > { %v1537_v22 = vpop.f32.mrb[1].mxu0  ;;  %v500_v23 = vadd.f32 %v1474_v18, %v499_v21 }
  0xe7   : > { %923 = vrot.lane.b32.xlu1 %v1805_v19, %s1668_s28  ;;  %756 = vrot.lane.b32.xlu0 %v1805_v19, %s1669_s29 }
  0xe8   : > { %1550 = vmatpush3.xpose.msk.msra.mxu1 %vm588_vm2, %v1805_v19 }
  0xe9   : > { %1554 = vmatprep.subr.mxu1 %v1667_v9 }
  0xeb   : > { %1552 = vmatmul.mubr.msk.f32.vlgmr.msra.gmra.mrb[2].mxu1 %vm588_vm2, %v500_v23  ;;  %921 = vrot.lane.b32.xlu1 %v500_v23, %s1668_s28 }
  0xec   : > { %754 = vrot.lane.b32.xlu0 %v500_v23, %s1669_s29  ;;  %1556 = vmatprep.mubr.msk.f32.mxu1 %vm1666_vm0, %v1667_v9  ;;  %s1675_s29 = smov 8  }
  0xef   : > { %1088 = vrot.lane.b32.xlu1 %v500_v23, %s1670_s30 }
  0xf0   : > { %1090 = vrot.lane.b32.xlu0 %v1805_v19, %s1670_s30  ;;  %s1676_s30 = smov 16  }
 0x159   : > { %v757_v24 = vpop.permute.xlu0 %756  ;;  %v924_v25 = vpop.permute.xlu1 %923 }
 0x15a   : > { %1560 = vmatpush3.xpose.msk.msra.mxu0 %vm588_vm2, %v757_v24 }
 0x15b   : > { %1569 = vmatprep.subr.mxu0 %v1667_v9 }
 0x15d   : > { %v922_v27 = vpop.permute.xlu1 %921 }
 0x15e   : > { %v755_v26 = vpop.permute.xlu0 %754 }
 0x15f   : > { %1562 = vmatmul.mubr.msk.f32.vlgmr.msra.gmra.mrb[2].mxu0 %vm588_vm2, %v755_v26 }
 0x160   : > { %1570 = vmatpush3.xpose.msk.msra.mxu0 %vm588_vm2, %v924_v25  ;;  %1571 = vmatprep.mubr.msk.f32.mxu0 %vm1666_vm0, %v1667_v9 }
 0x161   : > { %1579 = vmatprep.subr.mxu0 %v1667_v9  ;;  %v1089_v29 = vpop.permute.xlu1 %1088 }
 0x162   : > { %v1091_v28 = vpop.permute.xlu0 %1090 }
 0x163   : > { %1572 = vmatmul.mubr.msk.f32.vlgmr.msra.gmra.mrb[4].mxu0 %vm588_vm2, %v922_v27 }
 0x164   : > { %1580 = vmatpush3.xpose.msk.msra.mxu0 %vm588_vm2, %v1091_v28  ;;  %1581 = vmatprep.mubr.msk.f32.mxu0 %vm1666_vm0, %v1667_v9  ;;  %v1272_v28 = vld [vmem:[%s1902_s7] sm:$0xff] }
 0x165   : > { %1612 = vmatprep.subr.bf16.mxu0 %v1665_v3 }
 0x167   : > { %1582 = vmatmul.mubr.msk.f32.vlgmr.msra.gmra.mrb[6].mxu0 %vm588_vm2, %v1089_v29  ;;  %v1273_v29 = vld [vmem:[%s1902_s7 + $0x8] sm:$0xff] }
 0x168   : > { %1597 = vmatprep.mubr.msk.f32.mxu0 %vm1666_vm0, %v1667_v9 }
 0x1be   : > { %v661_v30 = vpop.f32.mrb[2].mxu1 }
 0x1bf   : > { %v665_v32 = vmul.f32 0.35355338, %v661_v30  ;;  %v1553_v33 = vpop.f32.mrb[3].mxu1  ;;  %v1613_v30 = vpack.c.bf16 %v1273_v29, %v1272_v28 }
 0x1c1   : > { %v666_v34 = vadd.f32 %v665_v32, %v587_v31  ;;  %1614 = vmatpush3.bf16.msra.mxu0 %v1613_v30 }
 0x1c2   : > { %1615 = vmatprep.subr.bf16.mxu0 %v1665_v3 }
 0x1c3   : > { %v667_v35 = vsel %vm588_vm2, %v666_v34, -inf }
 0x1c4   : > { %668 = vmax.xlane.f32.xlu0 %v667_v35 }
 0x232   : > { %v828_v36 = vpop.f32.mrb[2].mxu0 }
 0x233   : > { %v832_v37 = vmul.f32 0.35355338, %v828_v36  ;;  %v1563_v38 = vpop.f32.mrb[3].mxu0 }
 0x235   : > { %v833_v39 = vadd.f32 %v832_v37, %v587_v31 }
 0x236   : > { %v995_v40 = vpop.f32.mrb[4].mxu0 }
 0x237   : > { %v999_v41 = vmul.f32 0.35355338, %v995_v40  ;;  %v1573_v42 = vpop.f32.mrb[5].mxu0  ;;  %v834_v43 = vsel %vm588_vm2, %v833_v39, -inf }
 0x238   : > { %835 = vmax.xlane.f32.xlu1 %v834_v43 }
 0x239   : > { %v1000_v44 = vadd.f32 %v999_v41, %v587_v31 }
 0x23a   : > { %v1162_v45 = vpop.f32.mrb[6].mxu0 }
 0x23b   : > { %v1166_v46 = vmul.f32 0.35355338, %v1162_v45  ;;  %v1583_v47 = vpop.f32.mrb[7].mxu0  ;;  %v1001_v48 = vsel %vm588_vm2, %v1000_v44, -inf }
 0x23c   : > { %1002 = vmax.xlane.f32.xlu0 %v1001_v48 }
 0x23d   : > { %v1167_v49 = vadd.f32 %v1166_v46, %v587_v31  ;;  %v1275_v31 = vld [vmem:[%s1902_s7 + $0x18] sm:$0xff] }
 0x23f   : > { %v1168_v50 = vsel %vm588_vm2, %v1167_v49, -inf }
 0x240   : > { %1169 = vmax.xlane.f32.xlu0 %v1168_v50 }
 0x249   : > { %678 = vrot.lane.b32.xlu1 %v1805_v19, %s1671_s15 }
 0x251   : > { %v669_v51 = vpop.xlane.xlu0 %668 }
 0x252   : > { %v670_v52 = vsub.f32 %v666_v34, %v669_v51 }
 0x254   : > { %v671_v53 = vmul.f32 1.442695, %v670_v52 }
 0x256   : > { %1639 = vpow2.f32 %v671_v53 }
 0x260   : > { %v1640_v54 = vpop.eup %1639 }
 0x261   : > { %v673_v55 = vsel %vm588_vm2, %v1640_v54, 0.0 }
 0x26d   : > { %674 = vadd.xlane.f32.xlu1 %v673_v55 }
 0x2c5   : > { %v836_v56 = vpop.xlane.xlu1 %835 }
 0x2c6   : > { %v837_v57 = vsub.f32 %v833_v39, %v836_v56 }
 0x2c8   : > { %v838_v58 = vmul.f32 1.442695, %v837_v57 }
 0x2c9   : > { %v679_v59 = vpop.permute.xlu1 %678  ;;  %v1003_v60 = vpop.xlane.xlu0 %1002 }
 0x2ca   : > { %1641 = vpow2.f32 %v838_v58  ;;  %v1004_v61 = vsub.f32 %v1000_v44, %v1003_v60  ;;  %1555 = vmatpush3.msra.mxu1 %v679_v59  ;;  %v1490_v44 = vld [vmem:[%s1903_s8] ss:$0 sm:$0xff] }
 0x2cb   : > { %1564 = vmatprep.subr.mxu1 %v1667_v9  ;;  %v1493_v60 = vld [vmem:[%s1905_s10] ss:$0 sm:$0xff] }
 0x2cc   : > { %v1005_v62 = vmul.f32 1.442695, %v1004_v61 }
 0x2cd   : > { %v1170_v63 = vpop.xlane.xlu0 %1169 }
 0x2ce   : > { %1643 = vpow2.f32 %v1005_v62  ;;  %v1171_v0 = vsub.f32 %v1167_v49, %v1170_v63 }
 0x2d0   : > { %v1172_v1 = vmul.f32 1.442695, %v1171_v0 }
 0x2d2   : > { %1645 = vpow2.f32 %v1172_v1 }
 0x2d4   : > { %v1642_v2 = vpop.eup %1641 }
 0x2d5   : > { %v840_v4 = vsel %vm588_vm2, %v1642_v2, 0.0 }
 0x2d6   : > { %841 = vadd.xlane.f32.xlu0 %v840_v4 }
 0x2d8   : > { %v1644_v5 = vpop.eup %1643 }
 0x2d9   : > { %v1007_v6 = vsel %vm588_vm2, %v1644_v5, 0.0 }
 0x2da   : > { %1008 = vadd.xlane.f32.xlu1 %v1007_v6 }
 0x2dc   : > { %v1646_v7 = vpop.eup %1645 }
 0x2dd   : > { %v1174_v8 = vsel %vm588_vm2, %v1646_v7, 0.0 }
 0x2de   : > { %1175 = vadd.xlane.f32.xlu0 %v1174_v8 }
 0x2eb   : > { %1012 = vrot.lane.b32.xlu1 %v1805_v19, %s1672_s19 }
 0x2ef   : > { %1179 = vrot.lane.b32.xlu1 %v1805_v19, %s1673_s20 }
 0x2f4   : > { %845 = vrot.lane.b32.xlu0 %v1805_v19, %s1674_s21 }
 0x2fa   : > { %v675_v10 = vpop.xlane.xlu1 %674 }
 0x2fb   : > { %1647 = vrcp.f32 %v675_v10 }
 0x305   : > { %v1648_v11 = vpop.eup %1647 }
 0x306   : > { %v677_v12 = vmul.f32 %v1648_v11, %v1640_v54 }
 0x308   : > { %1557 = vmatmul.mubr.msk.f32.vlgmr.msra.gmra.mrb[4].mxu1 %vm588_vm2, %v677_v12 }
 0x309   : > { %1566 = vmatprep.mubr.msk.f32.mxu1 %vm1666_vm0, %v1667_v9 }
 0x363   : > { %v842_v13 = vpop.xlane.xlu0 %841 }
 0x364   : > { %1649 = vrcp.f32 %v842_v13 }
 0x367   : > { %v1009_v14 = vpop.xlane.xlu1 %1008 }
 0x368   : > { %1651 = vrcp.f32 %v1009_v14 }
 0x36b   : > { %v1176_v16 = vpop.xlane.xlu0 %1175  ;;  %v1013_v20 = vpop.permute.xlu1 %1012 }
 0x36c   : > { %1653 = vrcp.f32 %v1176_v16 }
 0x36e   : > { %v1650_v17 = vpop.eup %1649 }
 0x36f   : > { %v844_v18 = vmul.f32 %v1650_v17, %v1642_v2  ;;  %v846_v21 = vpop.permute.xlu0 %845  ;;  %v1180_v23 = vpop.permute.xlu1 %1179 }
 0x370   : > { %1565 = vmatpush3.msra.mxu1 %v846_v21 }
 0x371   : > { %1567 = vmatmul.mubr.msk.f32.vlgmr.msra.gmra.mrb[6].mxu1 %vm588_vm2, %v844_v18  ;;  %1574 = vmatprep.subr.mxu1 %v1667_v9 }
 0x372   : > { %v1652_v19 = vpop.eup %1651  ;;  %1575 = vmatpush3.msra.mxu1 %v1013_v20  ;;  %1576 = vmatprep.mubr.msk.f32.mxu1 %vm1666_vm0, %v1667_v9 }
 0x373   : > { %v1011_v22 = vmul.f32 %v1652_v19, %v1644_v5  ;;  %1584 = vmatprep.subr.mxu1 %v1667_v9 }
 0x375   : > { %1577 = vmatmul.mubr.msk.f32.vlgmr.msra.gmra.mrb[8].mxu1 %vm588_vm2, %v1011_v22 }
 0x376   : > { %v1654_v24 = vpop.eup %1653  ;;  %1585 = vmatpush3.msra.mxu1 %v1180_v23  ;;  %1586 = vmatprep.mubr.msk.f32.mxu1 %vm1666_vm0, %v1667_v9  ;;  %v1274_v9 = vld [vmem:[%s1902_s7 + $0x10] sm:$0xff] }
 0x377   : > { %v1178_v25 = vmul.f32 %v1654_v24, %v1646_v7  ;;  %v1616_v32 = vpack.c.bf16 %v1275_v31, %v1274_v9 }
 0x379   : > { %1587 = vmatmul.mubr.msk.f32.vlgmr.msra.gmra.mrb[10].mxu1 %vm588_vm2, %v1178_v25  ;;  %1617 = vmatpush3.bf16.msra.mxu0 %v1616_v32 }
 0x3db   : > { %v750_v26 = vpop.f32.mrb[4].mxu1 }
 0x3dc   : > { %v1558_v27 = vpop.f32.mrb[5].mxu1 }
 0x444   : > { %v917_v33 = vpop.f32.mrb[6].mxu1 }
 0x445   : > { %1256 = vrot.lane.b32.xlu0 %v917_v33, %s1675_s29  ;;  %v1568_v34 = vpop.f32.mrb[7].mxu1 }
 0x448   : > { %v1084_v35 = vpop.f32.mrb[8].mxu1 }
 0x449   : > { %1260 = vrot.lane.b32.xlu1 %v1084_v35, %s1676_s30  ;;  %v1578_v36 = vpop.f32.mrb[9].mxu1 }
 0x44c   : > { %v1251_v37 = vpop.f32.mrb[10].mxu1 }
 0x44d   : > { %1264 = vrot.lane.b32.xlu0 %v1251_v37, %s1677_s12  ;;  %v1588_v3 = vpop.f32.mrb[11].mxu1 }
 0x4b7   : > { %v1257_v38 = vpop.permute.xlu0 %1256 }
 0x4b8   : > { %v1267_v40 = vsel %vm588_vm2, %v750_v26, %v1257_v38 }
 0x4bb   : > { %v1261_v39 = vpop.permute.xlu1 %1260 }
 0x4bc   : > { %v1269_v41 = vsel %vm1268_vm3, %v1267_v40, %v1261_v39 }
 0x4bf   : > { %v1265_v42 = vpop.permute.xlu0 %1264 }
 0x4c0   : > { %v1271_v43 = vsel %vm1270_vm4, %v1269_v41, %v1265_v42 }
 0x4c1   : > { %1598 = vmatmul.mubr.msk.f32.vlgmr.msra.gmra.mrb[8].mxu0 %vm429_vm1, %v1271_v43 }
 0x594   : > { %v1352_v45 = vpop.f32.mrb[8].mxu0 }
 0x595   : > { %v1353_v46 = vadd.f32 %v1490_v44, %v1352_v45  ;;  %v1599_v47 = vpop.f32.mrb[9].mxu0 }
 0x597   : > { %v1356_v48 = vadd.f32 %v1353_v46, %v1788_v15  ;;  %v1492_v15 = vld [vmem:[%s1904_s9] ss:$0 sm:$0xff] }
 0x599   : > { %v1359_v49 = vsel %vm429_vm1, %v1356_v48, 0.0 }
 0x59a   : > { %1360 = vadd.xlane.f32.xlu1 %v1359_v49 }
 0x627   : > { %v1361_v50 = vpop.xlane.xlu1 %1360 }
 0x628   : > { %v1363_v51 = vmul.f32 0.03125, %v1361_v50 }
 0x62a   : > { %v1364_v52 = vsub.f32 %v1356_v48, %v1363_v51 }
 0x62c   : > { %v1365_v53 = vmul.f32 %v1364_v52, %v1364_v52 }
 0x62e   : > { %v1366_v54 = vsel %vm429_vm1, %v1365_v53, 0.0 }
 0x62f   : > { %1367 = vadd.xlane.f32.xlu0 %v1366_v54 }
 0x6bc   : > { %v1368_v55 = vpop.xlane.xlu0 %1367 }
 0x6bd   : > { %v1369_v56 = vmul.f32 0.03125, %v1368_v55 }
 0x6bf   : > { %v1370_v57 = vadd.f32 1e-12, %v1369_v56 }
 0x6c1   : > { %1655 = vrsqrt.f32 %v1370_v57 }
 0x6cb   : > { %v1656_v58 = vpop.eup %1655 }
 0x6cc   : > { %v1372_v59 = vmul.f32 %v1656_v58, %v1364_v52 }
 0x6ce   : > { %v1379_v61 = vmul.f32 %v1492_v15, %v1372_v59 }
 0x6d0   : > { %v1386_v62 = vadd.f32 %v1493_v60, %v1379_v61 }
 0x6d2   : > { %1387 = vst.msk [vmem:[%s415_s24] sm:$0xff] %vm429_vm1, %v1386_v62 }
 0x6d3 PF: > { %s21_s17 = sadd.s32 1, %s1663_s17  }
 0x6d4   : > { %p18_p4 = scmp.ge.s32.totalorder %s21_s17, 4  }
 0x6d6   :  { %20 = sbr.rel (!%p18_p4) target bundleno = 1 (0x1), region = 100 }

// kernel: bert2bert_forward.17
= control target key start
LH: loop header
LB: loop body
LE: loop exit
PB: predicated region body
PF: predicated region fallthrough
CT: control target
= control target key end

     0   :  { %vm16_vm0 = vcmask 523264   ;;  %v148_v4 = vmov 0   ;;  %s200_s0 = inlined_call_operand.vmem [shape: f32[16,64], index: 0, kind: input, shape index: {}]   ;;  %s201_s1 = inlined_call_operand.vmem [shape: s32[16,1], index: 1, kind: input, shape index: {}]   ;;  %s202_s2 = inlined_call_operand.hbm [shape: f32[1,1], index: 2, kind: output, shape index: {}]  }
   0x1   :  { %v12_v0 = vld [vmem:[%s200_s0] sm:$0xff]  ;;  %v13_v1 = vld [vmem:[%s200_s0 + $0x8] sm:$0xff]  ;;  %112 = vset.pattern.permute.xlu1 %v148_v4  ;;  %113 = vset.pattern.permute.xlu0 %v148_v4 }
   0x2   :  { %v14_v2 = vld [vmem:[%s201_s1] sm:$0xff]  ;;  %v17_v3 = vsel %vm16_vm0, %v12_v0, -inf }
   0x3   :  { %18 = vmax.xlane.f32.xlu0 %v17_v3  ;;  %44 = vperm.xlu1 %112, %v14_v2  }
   0x4   :  { %7 = vsyncpa [#allocation3], 0  ;;  %v20_v5 = vsel %vm16_vm0, %v13_v1, -inf  ;;  %v15_v6 = vld [vmem:[%s201_s1 + $0x8] sm:$0xff]  ;;  %v41_v11 = vlaneseq  ;;  %vm61_vm3 = vcmp.ne.s32.totalorder %v14_v2, 4294967196  ;;  %vm69_vm4 = vcmask 7168  }
   0x5   :  { %v149_v25 = vmov 0.0   ;;  %vm62_vm5 = vcmp.ne.s32.totalorder %v15_v6, 4294967196  ;;  %s150_s0 = smov [#allocation2]   ;;  %vm91_vm6 = vcmask 0  }
   0x6   :  { %v42_v15 = vand.u32 127, %v41_v11  ;;  %v107_v26 = vsel %vm61_vm3, 1.0, %v149_v25  ;;  %v108_v28 = vsel %vm62_vm5, 1.0, %v149_v25  ;;  %s99_s1 = sshll.u32 %s150_s0, 4  ;;  %s100_s1 = int_to_ptr.vmem [resolvable:$true] %s99_s1 }
   0x7   :  { %21 = vmax.xlane.f32.xlu0 %v20_v5  ;;  %47 = vperm.xlu1 %112, %v15_v6   ;;  %v79_v27 = vsel %vm69_vm4, %v107_v26, 0.0  ;;  %v80_v29 = vsel %vm69_vm4, %v108_v28, 0.0  ;;  %s124_s17 = scalar_lea.vmem %s100_s1, 16  ;;  %s128_s18 = scalar_lea.vmem %s100_s1, 32 }
   0x8   :  { %v81_v30 = vadd.f32 %v80_v29, %v79_v27  ;;  %p125_p0 = scmp.ne.s32.totalorder %s100_s1, %s124_s17  ;;  %p129_p1 = scmp.lt.s32.totalorder %s100_s1, %s100_s1 }
   0x9   :  { %p130_p2 = scmp.lt.s32.totalorder %s128_s18, %s124_s17 }
   0xa   :  { %v82_v31 = vrot.slane %v81_v30, 4 }
   0xb   :  { %p131_p3 = por %p130_p2, %p129_p1 }
   0xc   :  { %v83_v33 = vadd.f32 %v82_v31, %v81_v30 }
   0xd   :  { %p132_p4 = pnand %p131_p3, %p125_p0 }
   0xe   :  { %v84_v35 = vrot.slane %v83_v33, 2 }
  0x10   :  { %v85_v36 = vadd.f32 %v84_v35, %v83_v33 }
  0x12   :  { %v86_v41 = vrot.slane %v85_v36, 1 }
  0x14   :  { %v87_v46 = vadd.f32 %v86_v41, %v85_v36 }
  0x16   :  { %v88_v50 = vmax.f32 %v87_v46, 1.0 }
  0x82   :  { %v45_v14 = vpop.permute.xlu1 %44 }
  0x83   :  { %vm49_vm1 = vcmp.eq.s32.totalorder %v42_v15, %v45_v14 }
  0x84   :  { %v51_v18 = vsel %vm49_vm1, %v12_v0, 0.0 }
  0x85   :  { %v53_v20 = vsel %vm16_vm0, %v51_v18, 0.0 }
  0x86   :  { %v48_v16 = vpop.permute.xlu1 %47 }
  0x87   :  { %vm50_vm2 = vcmp.eq.s32.totalorder %v42_v15, %v48_v16 }
  0x88   :  { %v52_v22 = vsel %vm50_vm2, %v13_v1, 0.0 }
  0x89   :  { %v56_v24 = vsel %vm16_vm0, %v52_v22, 0.0 }
  0x90   :  { %v19_v7 = vpop.xlane.xlu0 %18 }
  0x91   :  { %v23_v8 = vsub.f32 %v12_v0, %v19_v7 }
  0x93   :  { %v25_v9 = vmul.f32 1.442695, %v23_v8 }
  0x94   :  { %v22_v10 = vpop.xlane.xlu0 %21 }
  0x95   :  { %114 = vpow2.f32 %v25_v9  ;;  %v24_v12 = vsub.f32 %v13_v1, %v22_v10 }
  0x97   :  { %v27_v13 = vmul.f32 1.442695, %v24_v12 }
  0x99   :  { %116 = vpow2.f32 %v27_v13 }
  0x9f   :  { %v115_v17 = vpop.eup %114 }
  0xa0   :  { %v29_v19 = vsel %vm16_vm0, %v115_v17, 0.0 }
  0xa1   :  { %30 = vadd.xlane.f32.xlu0 %v29_v19 }
  0xa3   :  { %v117_v21 = vpop.eup %116 }
  0xa4   :  { %v32_v23 = vsel %vm16_vm0, %v117_v21, 0.0 }
  0xa5   :  { %33 = vadd.xlane.f32.xlu1 %v32_v23  ;;  %54 = vadd.xlane.f32.xlu0 %v53_v20 }
  0xa9   :  { %57 = vadd.xlane.f32.xlu0 %v56_v24 }
 0x12e   :  { %v31_v32 = vpop.xlane.xlu0 %30 }
 0x12f   :  { %118 = vlog2.f32 %v31_v32 }
 0x132   :  { %v34_v34 = vpop.xlane.xlu1 %33  ;;  %v55_v39 = vpop.xlane.xlu0 %54 }
 0x133   :  { %120 = vlog2.f32 %v34_v34 }
 0x134   :  { %122 = vrcp.f32 %v88_v50 }
 0x136   :  { %v58_v47 = vpop.xlane.xlu0 %57 }
 0x139   :  { %v119_v37 = vpop.eup %118 }
 0x13a   :  { %v36_v38 = vmul.f32 0.6931472, %v119_v37 }
 0x13c   :  { %v39_v40 = vadd.f32 %v36_v38, %v19_v7 }
 0x13d   :  { %v121_v42 = vpop.eup %120 }
 0x13e   :  { %v38_v43 = vmul.f32 0.6931472, %v121_v42  ;;  %v59_v44 = vsub.f32 %v39_v40, %v55_v39  ;;  %v123_v60 = vpop.eup %122 }
 0x140   :  { %v40_v45 = vadd.f32 %v38_v43, %v22_v10  ;;  %v67_v48 = vmul.f32 %v107_v26, %v59_v44 }
 0x142   :  { %v60_v49 = vsub.f32 %v40_v45, %v58_v47  ;;  %v70_v52 = vsel %vm69_vm4, %v67_v48, 0.0 }
 0x144   :  { %v68_v51 = vmul.f32 %v108_v28, %v60_v49 }
 0x146   :  { %v71_v53 = vsel %vm69_vm4, %v68_v51, 0.0 }
 0x147   :  { %v72_v54 = vadd.f32 %v71_v53, %v70_v52 }
 0x149   :  { %v73_v55 = vrot.slane %v72_v54, 4 }
 0x14b   :  { %v74_v56 = vadd.f32 %v73_v55, %v72_v54 }
 0x14d   :  { %v75_v57 = vrot.slane %v74_v56, 2 }
 0x14f   :  { %v76_v58 = vadd.f32 %v75_v57, %v74_v56 }
 0x151   :  { %v77_v59 = vrot.slane %v76_v58, 1 }
 0x153   :  { %v78_v61 = vadd.f32 %v77_v59, %v76_v58 }
 0x155   :  { %v90_v62 = vmul.f32 %v123_v60, %v78_v61 }
 0x157   :  { %92 = vst.msk [vmem:[#allocation2] sm:$0x1] %vm91_vm6, %v90_v62 }
 0x158   :  { %135 = shalt.err (!%p132_p4)
}
 0x159   :  { %s136_s21 = scalar_lea.hbm %s202_s2, 16 }
 0x15a   :  { %p137_p5 = scmp.ne.s32.totalorder %s202_s2, %s136_s21  ;;  %p140_p6 = scmp.lt.u32.totalorder %s136_s21, %s202_s2 }
 0x15c   :  { %p142_p7 = pnand %p140_p6, %p137_p5 }
 0x15e   :  { %145 = shalt.err (!%p142_p7)
}
 0x15f   :  { %102 = dma.vmem_to_hbm [thread:$0]  %s100_s1, 16, %s202_s2, [#allocation3]  }
 0x160   :  { %146 = dma.done.wait [#allocation3], 16  }
 0x161   :  { %147 = vsyncadd [#allocation3], 4294967280 }
 0x162   :  { %106 = vsyncpa [#allocation3], 1 }

</bundles_post_ra>
